<compile_context>
chip_gen: v6e
topology: v6e:2x2x1
jax: 0.10.0
libtpu: 0.0.40
codegen_flags: <defaults>
</compile_context>

<pallas_src>
import jax
import jax.numpy as jnp
import numpy as np
from jax.experimental import pallas as pl
from jax.experimental.pallas import tpu as pltpu

EMBED = 128
FF_HIDDEN = 256
HEADS = 32
HEAD_DIM = EMBED // HEADS
LN_EPS = 1e-5
INV_SQRT_E = float(1.0 / np.sqrt(EMBED))


def _ln_f32(x, g, b):
    mu = jnp.mean(x, axis=-1, keepdims=True)
    var = jnp.mean((x - mu) ** 2, axis=-1, keepdims=True)
    return (x - mu) * jax.lax.rsqrt(var + LN_EPS) * g + b


# ------------- fused kernel: QKV proj + MHA + fc_out + LN1 + FFN + LN2 (B_TILE batches/step) -------------
def transformer_block_kernel(
    v_ref, k_ref, q_ref,                        # (B, S, E) f32 activations
    wq_ref, wk_ref, wv_ref, wo_ref,             # (E, E) bf16, (in, out); wq pre-scaled by 1/sqrt(E)
    hm_ref,                                     # (E, E) bf16 block-diagonal head-grouping matrix
    w1_ref, w2_ref,                             # (E, FF) / (FF, E) bf16
    bo_ref, g1_ref, be1_ref,                    # (1, E) f32
    bf1_ref,                                    # (1, FF) f32
    bf2_ref, g2_ref, be2_ref,                   # (1, E) f32
    out_ref,                                    # (B, S, E) f32
):
    f32 = jnp.float32
    bf16 = jnp.bfloat16
    B, S, E = q_ref.shape
    R = B * S

    q = q_ref[...]
    k = k_ref[...]
    v = v_ref[...]
    q_flat = q.reshape(R, E)                                   # f32, reused for residual

    # ---- Q/K/V projections: M = B*S rows per matmul (MXU stays streaming) ----
    qp = jnp.dot(q_flat.astype(bf16), wq_ref[...],
                 preferred_element_type=f32).reshape(B, S, E)  # already scaled by 1/sqrt(E)
    kp = jnp.dot(k.reshape(R, E).astype(bf16), wk_ref[...],
                 preferred_element_type=f32).reshape(B, S, E)
    vp = jnp.dot(v.reshape(R, E).astype(bf16), wv_ref[...],
                 preferred_element_type=f32).reshape(B, S, E)

    # ---- attention with heads kept lane-dense via block-diagonal matmul ----
    # energy_exp[b,q,k,e] = sum_{e'} qp[b,q,e'] * kp[b,k,e'] * HM[e',e]  (= per-head energy,
    # replicated across that head's lanes)
    prod = qp[:, :, None, :] * kp[:, None, :, :]               # (B, S, S, E) f32
    energy = jnp.dot(prod.reshape(R * S, E).astype(bf16), hm_ref[...],
                     preferred_element_type=f32).reshape(B, S, S, E)

    # stable softmax over the key axis (axis=2), f32, full 128-lane vregs
    m = jnp.max(energy, axis=2, keepdims=True)
    pexp = jnp.exp(energy - m)
    denom = jnp.sum(pexp, axis=2, keepdims=True)
    attn = pexp * pl.reciprocal(denom, approx=True)            # (B, S, S, E)

    # out_attn[b,q,e] = sum_k attn[b,q,k,e] * vp[b,k,e]
    out_attn = jnp.sum(attn * vp[:, None, :, :], axis=2)       # (B, S, E)

    # ---- fc_out + residual + LayerNorm1 ----
    a = jnp.dot(out_attn.reshape(R, E).astype(bf16), wo_ref[...],
                preferred_element_type=f32) + bo_ref[...]
    x = _ln_f32(a + q_flat, g1_ref[...], be1_ref[...])         # (R, E)
    # dropout: identity in eval mode

    # ---- feed-forward + residual + LayerNorm2 ----
    h = jnp.maximum(
        jnp.dot(x.astype(bf16), w1_ref[...], preferred_element_type=f32) + bf1_ref[...],
        0.0)
    f = jnp.dot(h.astype(bf16), w2_ref[...], preferred_element_type=f32) + bf2_ref[...]
    out_ref[...] = _ln_f32(f + x, g2_ref[...], be2_ref[...]).reshape(B, S, E)


def _pick_b_tile(n, s, target_rows=256, max_rows=2048):
    """Largest divisor of n whose row count b*s reaches ~target_rows (VMEM-bounded)."""
    best = 1
    for b in range(1, n + 1):
        if n % b:
            continue
        if b * s > max_rows:
            break
        best = b
        if b * s >= target_rows:
            break
    return best


def transformer_block(value, key, query, p):
    """value/key/query: (N, S, E) float32. Params in PyTorch convention (out, in)."""
    N, S, E = query.shape
    assert E == EMBED and S % 8 == 0, "S must be a multiple of 8; E must be 128"

    bf16 = jnp.bfloat16
    # one-time glue: transpose to (in, out), fold 1/sqrt(E) into wq, cast MXU operands to bf16
    wq_t = (p['wq'].T * INV_SQRT_E).astype(bf16)
    wk_t = p['wk'].T.astype(bf16)
    wv_t = p['wv'].T.astype(bf16)
    wo_t = p['wo'].T.astype(bf16)
    w1_t = p['w1'].T.astype(bf16)
    w2_t = p['w2'].T.astype(bf16)

    # block-diagonal head-grouping matrix: HM[e, e'] = 1 iff e//HEAD_DIM == e'//HEAD_DIM (exact in bf16)
    head_ids = np.arange(EMBED) // HEAD_DIM
    hm = jnp.asarray(head_ids[:, None] == head_ids[None, :], dtype=bf16)   # (E, E)

    b_tile = _pick_b_tile(N, S)
    grid = (N // b_tile,)
    # NOTE(v7x): if N is small/odd the grid may not split across both TensorCores; at large
    # N the "parallel" axis shards across cores automatically.

    act_spec = pl.BlockSpec((b_tile, S, EMBED), lambda n: (n, 0, 0))

    def const(shape):
        rank = len(shape)
        # whole array resident in VMEM; constant block index -> copy reused across grid steps
        return pl.BlockSpec(shape, lambda n, _r=rank: (0,) * _r)

    # advisory cost estimate for XLA's scheduler
    flops = N * (
        3 * 2 * S * E * E               # Q/K/V projections
        + 2 * S * S * E * E             # block-diagonal energy matmul
        + 2 * S * S * E                 # attn * V multiply-reduce
        + 2 * S * E * E                 # fc_out
        + 2 * 2 * S * E * FF_HIDDEN     # FFN
    )
    transcendentals = N * S * S * E     # softmax exp (lane-expanded)
    bytes_accessed = (
        4 * 4 * N * S * E                               # 3 inputs + 1 output, f32
        + 2 * (5 * E * E + 2 * E * FF_HIDDEN)           # bf16 weights
        + 4 * (6 * E + FF_HIDDEN)                       # f32 biases / LN params
    )
    cost = pl.CostEstimate(flops=flops, transcendentals=transcendentals,
                           bytes_accessed=bytes_accessed)

    out = pl.pallas_call(
        transformer_block_kernel,
        grid=grid,
        out_shape=jax.ShapeDtypeStruct((N, S, EMBED), jnp.float32),
        in_specs=[act_spec, act_spec, act_spec,
                  const((EMBED, EMBED)), const((EMBED, EMBED)),
                  const((EMBED, EMBED)), const((EMBED, EMBED)),
                  const((EMBED, EMBED)),
                  const((EMBED, FF_HIDDEN)), const((FF_HIDDEN, EMBED)),
                  const((1, EMBED)), const((1, EMBED)), const((1, EMBED)),
                  const((1, FF_HIDDEN)),
                  const((1, EMBED)), const((1, EMBED)), const((1, EMBED))],
        out_specs=act_spec,
        compiler_params=pltpu.CompilerParams(dimension_semantics=("parallel",)),
        cost_estimate=cost,
    )(value, key, query,
      wq_t, wk_t, wv_t, wo_t, hm, w1_t, w2_t,
      p['bo'].reshape(1, EMBED),
      p['g1'].reshape(1, EMBED), p['be1'].reshape(1, EMBED),
      p['bf1'].reshape(1, FF_HIDDEN),
      p['bf2'].reshape(1, EMBED),
      p['g2'].reshape(1, EMBED), p['be2'].reshape(1, EMBED))
    return out


# ---------------- pure-JAX f32 reference (mirrors the PyTorch forward) ----------------
def _layernorm(x, g, b):
    mu = jnp.mean(x, -1, keepdims=True)
    var = jnp.mean((x - mu) ** 2, -1, keepdims=True)
    return (x - mu) / jnp.sqrt(var + LN_EPS) * g + b


def ref_forward(value, key, query, p):
    N, S, _ = query.shape
    V = value @ p['wv'].T
    K = key @ p['wk'].T
    Q = query @ p['wq'].T
    Vh = V.reshape(N, S, HEADS, HEAD_DIM)
    Kh = K.reshape(N, S, HEADS, HEAD_DIM)
    Qh = Q.reshape(N, S, HEADS, HEAD_DIM)
    energy = jnp.einsum('nqhd,nkhd->nhqk', Qh, Kh)
    att = jax.nn.softmax(energy / jnp.sqrt(jnp.float32(EMBED)), axis=3)
    out = jnp.einsum('nhql,nlhd->nqhd', att, Vh).reshape(N, S, EMBED)
    out = out @ p['wo'].T + p['bo']
    x = _layernorm(out + query, p['g1'], p['be1'])
    f = jnp.maximum(x @ p['w1'].T + p['bf1'], 0.0) @ p['w2'].T + p['bf2']
    return _layernorm(f + x, p['g2'], p['be2'])


def init_params(key):
    ks = jax.random.split(key, 10)
    n = lambda k, s: (0.05 * jax.random.normal(k, s)).astype(jnp.float32)
    return dict(
        wq=n(ks[0], (EMBED, EMBED)),
        wk=n(ks[1], (EMBED, EMBED)),
        wv=n(ks[2], (EMBED, EMBED)),
        wo=n(ks[3], (EMBED, EMBED)),
        bo=n(ks[4], (EMBED,)),
        w1=n(ks[5], (FF_HIDDEN, EMBED)),
        bf1=n(ks[6], (FF_HIDDEN,)),
        w2=n(ks[7], (EMBED, FF_HIDDEN)),
        bf2=n(ks[8], (EMBED,)),
        g1=jnp.ones((EMBED,), jnp.float32),
        be1=jnp.zeros((EMBED,), jnp.float32),
        g2=jnp.ones((EMBED,), jnp.float32),
        be2=jnp.zeros((EMBED,), jnp.float32),
    )


if __name__ == "__main__":
    N, S = 2, 8  # batch=2, seq=8, embed=128 (forced by module constants)
    root = jax.random.PRNGKey(0)
    k0, k1, k2, kp = jax.random.split(root, 4)
    value = jax.random.normal(k0, (N, S, EMBED), dtype=jnp.float32)
    key = jax.random.normal(k1, (N, S, EMBED), dtype=jnp.float32)
    query = jax.random.normal(k2, (N, S, EMBED), dtype=jnp.float32)

    params = init_params(kp)

    out = transformer_block(value, key, query, params)
    out = jax.block_until_ready(out)

    ref = jax.block_until_ready(ref_forward(value, key, query, params))
    # bf16 MXU operands with f32 accumulation vs f32 reference -> slightly looser tolerance
    np.testing.assert_allclose(np.asarray(out), np.asarray(ref), rtol=2e-2, atol=2e-2)

    print("KERNEL_OK")
</pallas_src>

<mosaic_0001>
module attributes {stable_mosaic.version = 11 : i64} {
  func.func @transformer_block_kernel(%arg0: i32, %arg1: memref<2x8x128xf32, #tpu.memory_space<vmem>>, %arg2: memref<2x8x128xf32, #tpu.memory_space<vmem>>, %arg3: memref<2x8x128xf32, #tpu.memory_space<vmem>>, %arg4: memref<128x128xbf16, #tpu.memory_space<vmem>>, %arg5: memref<128x128xbf16, #tpu.memory_space<vmem>>, %arg6: memref<128x128xbf16, #tpu.memory_space<vmem>>, %arg7: memref<128x128xbf16, #tpu.memory_space<vmem>>, %arg8: memref<128x128xbf16, #tpu.memory_space<vmem>>, %arg9: memref<128x256xbf16, #tpu.memory_space<vmem>>, %arg10: memref<256x128xbf16, #tpu.memory_space<vmem>>, %arg11: memref<1x128xf32, #tpu.memory_space<vmem>>, %arg12: memref<1x128xf32, #tpu.memory_space<vmem>>, %arg13: memref<1x128xf32, #tpu.memory_space<vmem>>, %arg14: memref<1x256xf32, #tpu.memory_space<vmem>>, %arg15: memref<1x128xf32, #tpu.memory_space<vmem>>, %arg16: memref<1x128xf32, #tpu.memory_space<vmem>>, %arg17: memref<1x128xf32, #tpu.memory_space<vmem>>, %arg18: memref<2x8x128xf32, #tpu.memory_space<vmem>>) attributes {dimension_semantics = [#tpu.dimension_semantics<parallel>], iteration_bounds = array<i64: 1>, scalar_prefetch = 0 : i64, scratch_operands = 0 : i64, tpu.core_type = #tpu.core_type<tc>, window_params = [{transform_indices = @transform_0, window_bounds = array<i64: 2, 8, 128>}, {transform_indices = @transform_1, window_bounds = array<i64: 2, 8, 128>}, {transform_indices = @transform_2, window_bounds = array<i64: 2, 8, 128>}, {pipeline_mode = #tpu.pipeline_mode<synchronous>, transform_indices = @transform_3, window_bounds = array<i64: 128, 128>}, {pipeline_mode = #tpu.pipeline_mode<synchronous>, transform_indices = @transform_4, window_bounds = array<i64: 128, 128>}, {pipeline_mode = #tpu.pipeline_mode<synchronous>, transform_indices = @transform_5, window_bounds = array<i64: 128, 128>}, {pipeline_mode = #tpu.pipeline_mode<synchronous>, transform_indices = @transform_6, window_bounds = array<i64: 128, 128>}, {pipeline_mode = #tpu.pipeline_mode<synchronous>, transform_indices = @transform_7, window_bounds = array<i64: 128, 128>}, {pipeline_mode = #tpu.pipeline_mode<synchronous>, transform_indices = @transform_8, window_bounds = array<i64: 128, 256>}, {pipeline_mode = #tpu.pipeline_mode<synchronous>, transform_indices = @transform_9, window_bounds = array<i64: 256, 128>}, {pipeline_mode = #tpu.pipeline_mode<synchronous>, transform_indices = @transform_10, window_bounds = array<i64: 1, 128>}, {pipeline_mode = #tpu.pipeline_mode<synchronous>, transform_indices = @transform_11, window_bounds = array<i64: 1, 128>}, {pipeline_mode = #tpu.pipeline_mode<synchronous>, transform_indices = @transform_12, window_bounds = array<i64: 1, 128>}, {pipeline_mode = #tpu.pipeline_mode<synchronous>, transform_indices = @transform_13, window_bounds = array<i64: 1, 256>}, {pipeline_mode = #tpu.pipeline_mode<synchronous>, transform_indices = @transform_14, window_bounds = array<i64: 1, 128>}, {pipeline_mode = #tpu.pipeline_mode<synchronous>, transform_indices = @transform_15, window_bounds = array<i64: 1, 128>}, {pipeline_mode = #tpu.pipeline_mode<synchronous>, transform_indices = @transform_16, window_bounds = array<i64: 1, 128>}, {transform_indices = @transform_17, window_bounds = array<i64: 2, 8, 128>}]} {
    %c0 = arith.constant 0 : index
    %c0_0 = arith.constant 0 : index
    %c0_1 = arith.constant 0 : index
    %0 = vector.load %arg3[%c0, %c0_0, %c0_1] : memref<2x8x128xf32, #tpu.memory_space<vmem>>, vector<2x8x128xf32>
    %c0_2 = arith.constant 0 : index
    %c0_3 = arith.constant 0 : index
    %c0_4 = arith.constant 0 : index
    %1 = vector.load %arg2[%c0_2, %c0_3, %c0_4] : memref<2x8x128xf32, #tpu.memory_space<vmem>>, vector<2x8x128xf32>
    %c0_5 = arith.constant 0 : index
    %c0_6 = arith.constant 0 : index
    %c0_7 = arith.constant 0 : index
    %2 = vector.load %arg1[%c0_5, %c0_6, %c0_7] : memref<2x8x128xf32, #tpu.memory_space<vmem>>, vector<2x8x128xf32>
    %3 = vector.shape_cast %0 : vector<2x8x128xf32> to vector<16x128xf32>
    %4 = arith.truncf %3 : vector<16x128xf32> to vector<16x128xbf16>
    %c0_8 = arith.constant 0 : index
    %c0_9 = arith.constant 0 : index
    %5 = vector.load %arg4[%c0_8, %c0_9] : memref<128x128xbf16, #tpu.memory_space<vmem>>, vector<128x128xbf16>
    %cst = arith.constant dense<0.000000e+00> : vector<16x128xf32>
    %6 = tpu.matmul %4, %5, %cst {dimension_numbers = #tpu.dot_dimension_numbers<[1], [0], [0], [1], [0, 0, 1, 1], [], []>} : vector<16x128xbf16>, vector<128x128xbf16>, vector<16x128xf32> -> vector<16x128xf32>
    %7 = vector.shape_cast %6 : vector<16x128xf32> to vector<2x8x128xf32>
    %8 = vector.shape_cast %1 : vector<2x8x128xf32> to vector<16x128xf32>
    %9 = arith.truncf %8 : vector<16x128xf32> to vector<16x128xbf16>
    %c0_10 = arith.constant 0 : index
    %c0_11 = arith.constant 0 : index
    %10 = vector.load %arg5[%c0_10, %c0_11] : memref<128x128xbf16, #tpu.memory_space<vmem>>, vector<128x128xbf16>
    %cst_12 = arith.constant dense<0.000000e+00> : vector<16x128xf32>
    %11 = tpu.matmul %9, %10, %cst_12 {dimension_numbers = #tpu.dot_dimension_numbers<[1], [0], [0], [1], [0, 0, 1, 1], [], []>} : vector<16x128xbf16>, vector<128x128xbf16>, vector<16x128xf32> -> vector<16x128xf32>
    %12 = vector.shape_cast %11 : vector<16x128xf32> to vector<2x8x128xf32>
    %13 = vector.shape_cast %2 : vector<2x8x128xf32> to vector<16x128xf32>
    %14 = arith.truncf %13 : vector<16x128xf32> to vector<16x128xbf16>
    %c0_13 = arith.constant 0 : index
    %c0_14 = arith.constant 0 : index
    %15 = vector.load %arg6[%c0_13, %c0_14] : memref<128x128xbf16, #tpu.memory_space<vmem>>, vector<128x128xbf16>
    %cst_15 = arith.constant dense<0.000000e+00> : vector<16x128xf32>
    %16 = tpu.matmul %14, %15, %cst_15 {dimension_numbers = #tpu.dot_dimension_numbers<[1], [0], [0], [1], [0, 0, 1, 1], [], []>} : vector<16x128xbf16>, vector<128x128xbf16>, vector<16x128xf32> -> vector<16x128xf32>
    %17 = vector.shape_cast %16 : vector<16x128xf32> to vector<2x8x128xf32>
    %18 = vector.shape_cast %7 : vector<2x8x128xf32> to vector<2x8x1x128xf32>
    %19 = vector.shape_cast %12 : vector<2x8x128xf32> to vector<2x1x8x128xf32>
    %20 = vector.broadcast %18 : vector<2x8x1x128xf32> to vector<2x8x8x128xf32>
    %21 = vector.broadcast %19 : vector<2x1x8x128xf32> to vector<2x8x8x128xf32>
    %22 = arith.mulf %20, %21 : vector<2x8x8x128xf32>
    %23 = vector.shape_cast %22 : vector<2x8x8x128xf32> to vector<128x128xf32>
    %24 = arith.truncf %23 : vector<128x128xf32> to vector<128x128xbf16>
    %c0_16 = arith.constant 0 : index
    %c0_17 = arith.constant 0 : index
    %25 = vector.load %arg8[%c0_16, %c0_17] : memref<128x128xbf16, #tpu.memory_space<vmem>>, vector<128x128xbf16>
    %cst_18 = arith.constant dense<0.000000e+00> : vector<128x128xf32>
    %26 = tpu.matmul %24, %25, %cst_18 {dimension_numbers = #tpu.dot_dimension_numbers<[1], [0], [0], [1], [0, 0, 1, 1], [], []>} : vector<128x128xbf16>, vector<128x128xbf16>, vector<128x128xf32> -> vector<128x128xf32>
    %27 = vector.shape_cast %26 : vector<128x128xf32> to vector<2x8x8x128xf32>
    %cst_19 = arith.constant dense<0xFF800000> : vector<2x8x128xf32>
    %28 = vector.multi_reduction <maximumf>, %27, %cst_19 [2] : vector<2x8x8x128xf32> to vector<2x8x128xf32>
    %29 = vector.shape_cast %28 : vector<2x8x128xf32> to vector<2x8x1x128xf32>
    %30 = vector.broadcast %29 : vector<2x8x1x128xf32> to vector<2x8x8x128xf32>
    %31 = arith.subf %27, %30 : vector<2x8x8x128xf32>
    %32 = math.exp %31 : vector<2x8x8x128xf32>
    %cst_20 = arith.constant dense<0.000000e+00> : vector<2x8x128xf32>
    %33 = vector.multi_reduction <add>, %32, %cst_20 [2] : vector<2x8x8x128xf32> to vector<2x8x128xf32>
    %34 = vector.shape_cast %33 : vector<2x8x128xf32> to vector<2x8x1x128xf32>
    %35 = tpu.reciprocal %34 {approx = true} : vector<2x8x1x128xf32> -> vector<2x8x1x128xf32>
    %36 = vector.broadcast %35 : vector<2x8x1x128xf32> to vector<2x8x8x128xf32>
    %37 = arith.mulf %32, %36 : vector<2x8x8x128xf32>
    %38 = vector.shape_cast %17 : vector<2x8x128xf32> to vector<2x1x8x128xf32>
    %39 = vector.broadcast %38 : vector<2x1x8x128xf32> to vector<2x8x8x128xf32>
    %40 = arith.mulf %37, %39 : vector<2x8x8x128xf32>
    %cst_21 = arith.constant dense<0.000000e+00> : vector<2x8x128xf32>
    %41 = vector.multi_reduction <add>, %40, %cst_21 [2] : vector<2x8x8x128xf32> to vector<2x8x128xf32>
    %42 = vector.shape_cast %41 : vector<2x8x128xf32> to vector<16x128xf32>
    %43 = arith.truncf %42 : vector<16x128xf32> to vector<16x128xbf16>
    %c0_22 = arith.constant 0 : index
    %c0_23 = arith.constant 0 : index
    %44 = vector.load %arg7[%c0_22, %c0_23] : memref<128x128xbf16, #tpu.memory_space<vmem>>, vector<128x128xbf16>
    %cst_24 = arith.constant dense<0.000000e+00> : vector<16x128xf32>
    %45 = tpu.matmul %43, %44, %cst_24 {dimension_numbers = #tpu.dot_dimension_numbers<[1], [0], [0], [1], [0, 0, 1, 1], [], []>} : vector<16x128xbf16>, vector<128x128xbf16>, vector<16x128xf32> -> vector<16x128xf32>
    %c0_25 = arith.constant 0 : index
    %c0_26 = arith.constant 0 : index
    %46 = vector.load %arg11[%c0_25, %c0_26] : memref<1x128xf32, #tpu.memory_space<vmem>>, vector<1x128xf32>
    %47 = vector.broadcast %46 : vector<1x128xf32> to vector<16x128xf32>
    %48 = arith.addf %45, %47 : vector<16x128xf32>
    %49 = arith.addf %48, %3 : vector<16x128xf32>
    %c0_27 = arith.constant 0 : index
    %c0_28 = arith.constant 0 : index
    %50 = vector.load %arg12[%c0_27, %c0_28] : memref<1x128xf32, #tpu.memory_space<vmem>>, vector<1x128xf32>
    %c0_29 = arith.constant 0 : index
    %c0_30 = arith.constant 0 : index
    %51 = vector.load %arg13[%c0_29, %c0_30] : memref<1x128xf32, #tpu.memory_space<vmem>>, vector<1x128xf32>
    %cst_31 = arith.constant dense<0.000000e+00> : vector<16xf32>
    %52 = vector.multi_reduction <add>, %49, %cst_31 [1] : vector<16x128xf32> to vector<16xf32>
    %53 = vector.shape_cast %52 : vector<16xf32> to vector<16x1xf32>
    %cst_32 = arith.constant 1.280000e+02 : f32
    %54 = vector.broadcast %cst_32 : f32 to vector<16x1xf32>
    %55 = arith.divf %53, %54 : vector<16x1xf32>
    %56 = vector.broadcast %55 : vector<16x1xf32> to vector<16x128xf32>
    %57 = arith.subf %49, %56 : vector<16x128xf32>
    %58 = arith.mulf %57, %57 : vector<16x128xf32>
    %cst_33 = arith.constant dense<0.000000e+00> : vector<16xf32>
    %59 = vector.multi_reduction <add>, %58, %cst_33 [1] : vector<16x128xf32> to vector<16xf32>
    %60 = vector.shape_cast %59 : vector<16xf32> to vector<16x1xf32>
    %cst_34 = arith.constant 1.280000e+02 : f32
    %61 = vector.broadcast %cst_34 : f32 to vector<16x1xf32>
    %62 = arith.divf %60, %61 : vector<16x1xf32>
    %63 = vector.broadcast %55 : vector<16x1xf32> to vector<16x128xf32>
    %64 = arith.subf %49, %63 : vector<16x128xf32>
    %cst_35 = arith.constant 9.99999974E-6 : f32
    %65 = vector.broadcast %cst_35 : f32 to vector<16x1xf32>
    %66 = arith.addf %62, %65 : vector<16x1xf32>
    %67 = math.rsqrt %66 : vector<16x1xf32>
    %68 = vector.broadcast %67 : vector<16x1xf32> to vector<16x128xf32>
    %69 = arith.mulf %64, %68 : vector<16x128xf32>
    %70 = vector.broadcast %50 : vector<1x128xf32> to vector<16x128xf32>
    %71 = arith.mulf %69, %70 : vector<16x128xf32>
    %72 = vector.broadcast %51 : vector<1x128xf32> to vector<16x128xf32>
    %73 = arith.addf %71, %72 : vector<16x128xf32>
    %74 = arith.truncf %73 : vector<16x128xf32> to vector<16x128xbf16>
    %c0_36 = arith.constant 0 : index
    %c0_37 = arith.constant 0 : index
    %75 = vector.load %arg9[%c0_36, %c0_37] : memref<128x256xbf16, #tpu.memory_space<vmem>>, vector<128x256xbf16>
    %cst_38 = arith.constant dense<0.000000e+00> : vector<16x256xf32>
    %76 = tpu.matmul %74, %75, %cst_38 {dimension_numbers = #tpu.dot_dimension_numbers<[1], [0], [0], [1], [0, 0, 1, 1], [], []>} : vector<16x128xbf16>, vector<128x256xbf16>, vector<16x256xf32> -> vector<16x256xf32>
    %c0_39 = arith.constant 0 : index
    %c0_40 = arith.constant 0 : index
    %77 = vector.load %arg14[%c0_39, %c0_40] : memref<1x256xf32, #tpu.memory_space<vmem>>, vector<1x256xf32>
    %78 = vector.broadcast %77 : vector<1x256xf32> to vector<16x256xf32>
    %79 = arith.addf %76, %78 : vector<16x256xf32>
    %cst_41 = arith.constant 0.000000e+00 : f32
    %80 = vector.broadcast %cst_41 : f32 to vector<16x256xf32>
    %81 = arith.maximumf %79, %80 : vector<16x256xf32>
    %82 = arith.truncf %81 : vector<16x256xf32> to vector<16x256xbf16>
    %c0_42 = arith.constant 0 : index
    %c0_43 = arith.constant 0 : index
    %83 = vector.load %arg10[%c0_42, %c0_43] : memref<256x128xbf16, #tpu.memory_space<vmem>>, vector<256x128xbf16>
    %cst_44 = arith.constant dense<0.000000e+00> : vector<16x128xf32>
    %84 = tpu.matmul %82, %83, %cst_44 {dimension_numbers = #tpu.dot_dimension_numbers<[1], [0], [0], [1], [0, 0, 1, 1], [], []>} : vector<16x256xbf16>, vector<256x128xbf16>, vector<16x128xf32> -> vector<16x128xf32>
    %c0_45 = arith.constant 0 : index
    %c0_46 = arith.constant 0 : index
    %85 = vector.load %arg15[%c0_45, %c0_46] : memref<1x128xf32, #tpu.memory_space<vmem>>, vector<1x128xf32>
    %86 = vector.broadcast %85 : vector<1x128xf32> to vector<16x128xf32>
    %87 = arith.addf %84, %86 : vector<16x128xf32>
    %88 = arith.addf %87, %73 : vector<16x128xf32>
    %c0_47 = arith.constant 0 : index
    %c0_48 = arith.constant 0 : index
    %89 = vector.load %arg16[%c0_47, %c0_48] : memref<1x128xf32, #tpu.memory_space<vmem>>, vector<1x128xf32>
    %c0_49 = arith.constant 0 : index
    %c0_50 = arith.constant 0 : index
    %90 = vector.load %arg17[%c0_49, %c0_50] : memref<1x128xf32, #tpu.memory_space<vmem>>, vector<1x128xf32>
    %cst_51 = arith.constant dense<0.000000e+00> : vector<16xf32>
    %91 = vector.multi_reduction <add>, %88, %cst_51 [1] : vector<16x128xf32> to vector<16xf32>
    %92 = vector.shape_cast %91 : vector<16xf32> to vector<16x1xf32>
    %cst_52 = arith.constant 1.280000e+02 : f32
    %93 = vector.broadcast %cst_52 : f32 to vector<16x1xf32>
    %94 = arith.divf %92, %93 : vector<16x1xf32>
    %95 = vector.broadcast %94 : vector<16x1xf32> to vector<16x128xf32>
    %96 = arith.subf %88, %95 : vector<16x128xf32>
    %97 = arith.mulf %96, %96 : vector<16x128xf32>
    %cst_53 = arith.constant dense<0.000000e+00> : vector<16xf32>
    %98 = vector.multi_reduction <add>, %97, %cst_53 [1] : vector<16x128xf32> to vector<16xf32>
    %99 = vector.shape_cast %98 : vector<16xf32> to vector<16x1xf32>
    %cst_54 = arith.constant 1.280000e+02 : f32
    %100 = vector.broadcast %cst_54 : f32 to vector<16x1xf32>
    %101 = arith.divf %99, %100 : vector<16x1xf32>
    %102 = vector.broadcast %94 : vector<16x1xf32> to vector<16x128xf32>
    %103 = arith.subf %88, %102 : vector<16x128xf32>
    %cst_55 = arith.constant 9.99999974E-6 : f32
    %104 = vector.broadcast %cst_55 : f32 to vector<16x1xf32>
    %105 = arith.addf %101, %104 : vector<16x1xf32>
    %106 = math.rsqrt %105 : vector<16x1xf32>
    %107 = vector.broadcast %106 : vector<16x1xf32> to vector<16x128xf32>
    %108 = arith.mulf %103, %107 : vector<16x128xf32>
    %109 = vector.broadcast %89 : vector<1x128xf32> to vector<16x128xf32>
    %110 = arith.mulf %108, %109 : vector<16x128xf32>
    %111 = vector.broadcast %90 : vector<1x128xf32> to vector<16x128xf32>
    %112 = arith.addf %110, %111 : vector<16x128xf32>
    %113 = vector.shape_cast %112 : vector<16x128xf32> to vector<2x8x128xf32>
    %c0_56 = arith.constant 0 : index
    %c0_57 = arith.constant 0 : index
    %c0_58 = arith.constant 0 : index
    %114 = vector.load %arg18[%c0_56, %c0_57, %c0_58] : memref<2x8x128xf32, #tpu.memory_space<vmem>>, vector<2x8x128xf32>
    tpu.vector_store %arg18[%c0_56, %c0_57, %c0_58], %113 {strides = array<i32>} : memref<2x8x128xf32, #tpu.memory_space<vmem>>, vector<2x8x128xf32>,
    return
  }
  func.func @transform_0(%arg0: i32) -> (i32, i32, i32) {
    %c0_i32 = arith.constant 0 : i32
    %c0_i32_0 = arith.constant 0 : i32
    %c0_i32_1 = arith.constant 0 : i32
    return %arg0, %c0_i32, %c0_i32_0 : i32, i32, i32
  }
  func.func @transform_1(%arg0: i32) -> (i32, i32, i32) {
    %c0_i32 = arith.constant 0 : i32
    %c0_i32_0 = arith.constant 0 : i32
    %c0_i32_1 = arith.constant 0 : i32
    return %arg0, %c0_i32, %c0_i32_0 : i32, i32, i32
  }
  func.func @transform_2(%arg0: i32) -> (i32, i32, i32) {
    %c0_i32 = arith.constant 0 : i32
    %c0_i32_0 = arith.constant 0 : i32
    %c0_i32_1 = arith.constant 0 : i32
    return %arg0, %c0_i32, %c0_i32_0 : i32, i32, i32
  }
  func.func @transform_3(%arg0: i32) -> (i32, i32) {
    %c0_i32 = arith.constant 0 : i32
    %c0_i32_0 = arith.constant 0 : i32
    %c0_i32_1 = arith.constant 0 : i32
    return %c0_i32, %c0_i32_0 : i32, i32
  }
  func.func @transform_4(%arg0: i32) -> (i32, i32) {
    %c0_i32 = arith.constant 0 : i32
    %c0_i32_0 = arith.constant 0 : i32
    %c0_i32_1 = arith.constant 0 : i32
    return %c0_i32, %c0_i32_0 : i32, i32
  }
  func.func @transform_5(%arg0: i32) -> (i32, i32) {
    %c0_i32 = arith.constant 0 : i32
    %c0_i32_0 = arith.constant 0 : i32
    %c0_i32_1 = arith.constant 0 : i32
    return %c0_i32, %c0_i32_0 : i32, i32
  }
  func.func @transform_6(%arg0: i32) -> (i32, i32) {
    %c0_i32 = arith.constant 0 : i32
    %c0_i32_0 = arith.constant 0 : i32
    %c0_i32_1 = arith.constant 0 : i32
    return %c0_i32, %c0_i32_0 : i32, i32
  }
  func.func @transform_7(%arg0: i32) -> (i32, i32) {
    %c0_i32 = arith.constant 0 : i32
    %c0_i32_0 = arith.constant 0 : i32
    %c0_i32_1 = arith.constant 0 : i32
    return %c0_i32, %c0_i32_0 : i32, i32
  }
  func.func @transform_8(%arg0: i32) -> (i32, i32) {
    %c0_i32 = arith.constant 0 : i32
    %c0_i32_0 = arith.constant 0 : i32
    %c0_i32_1 = arith.constant 0 : i32
    return %c0_i32, %c0_i32_0 : i32, i32
  }
  func.func @transform_9(%arg0: i32) -> (i32, i32) {
    %c0_i32 = arith.constant 0 : i32
    %c0_i32_0 = arith.constant 0 : i32
    %c0_i32_1 = arith.constant 0 : i32
    return %c0_i32, %c0_i32_0 : i32, i32
  }
  func.func @transform_10(%arg0: i32) -> (i32, i32) {
    %c0_i32 = arith.constant 0 : i32
    %c0_i32_0 = arith.constant 0 : i32
    %c0_i32_1 = arith.constant 0 : i32
    return %c0_i32, %c0_i32_0 : i32, i32
  }
  func.func @transform_11(%arg0: i32) -> (i32, i32) {
    %c0_i32 = arith.constant 0 : i32
    %c0_i32_0 = arith.constant 0 : i32
    %c0_i32_1 = arith.constant 0 : i32
    return %c0_i32, %c0_i32_0 : i32, i32
  }
  func.func @transform_12(%arg0: i32) -> (i32, i32) {
    %c0_i32 = arith.constant 0 : i32
    %c0_i32_0 = arith.constant 0 : i32
    %c0_i32_1 = arith.constant 0 : i32
    return %c0_i32, %c0_i32_0 : i32, i32
  }
  func.func @transform_13(%arg0: i32) -> (i32, i32) {
    %c0_i32 = arith.constant 0 : i32
    %c0_i32_0 = arith.constant 0 : i32
    %c0_i32_1 = arith.constant 0 : i32
    return %c0_i32, %c0_i32_0 : i32, i32
  }
  func.func @transform_14(%arg0: i32) -> (i32, i32) {
    %c0_i32 = arith.constant 0 : i32
    %c0_i32_0 = arith.constant 0 : i32
    %c0_i32_1 = arith.constant 0 : i32
    return %c0_i32, %c0_i32_0 : i32, i32
  }
  func.func @transform_15(%arg0: i32) -> (i32, i32) {
    %c0_i32 = arith.constant 0 : i32
    %c0_i32_0 = arith.constant 0 : i32
    %c0_i32_1 = arith.constant 0 : i32
    return %c0_i32, %c0_i32_0 : i32, i32
  }
  func.func @transform_16(%arg0: i32) -> (i32, i32) {
    %c0_i32 = arith.constant 0 : i32
    %c0_i32_0 = arith.constant 0 : i32
    %c0_i32_1 = arith.constant 0 : i32
    return %c0_i32, %c0_i32_0 : i32, i32
  }
  func.func @transform_17(%arg0: i32) -> (i32, i32, i32) {
    %c0_i32 = arith.constant 0 : i32
    %c0_i32_0 = arith.constant 0 : i32
    %c0_i32_1 = arith.constant 0 : i32
    return %arg0, %c0_i32, %c0_i32_0 : i32, i32, i32
  }
}

</mosaic_0001>

<bundles_post_ra>
// kernel: tpu_custom_call.1
= control target key start
LH: loop header
LB: loop body
LE: loop exit
PB: predicated region body
PF: predicated region fallthrough
CT: control target
= control target key end

     0   :  { %s3029_s0 = inlined_call_operand.hbm [shape: f32[2,8,128], index: 0, kind: input, shape index: {}]   ;;  %s3030_s1 = inlined_call_operand.hbm [shape: f32[2,8,128], index: 1, kind: input, shape index: {}]   ;;  %s3031_s2 = inlined_call_operand.hbm [shape: f32[2,8,128], index: 2, kind: input, shape index: {}]   ;;  %s3032_s3 = inlined_call_operand.hbm [shape: bf16[128,128], index: 3, kind: input, shape index: {}]   ;;  %s3033_s4 = inlined_call_operand.hbm [shape: bf16[128,128], index: 4, kind: input, shape index: {}]   ;;  %s3034_s5 = inlined_call_operand.hbm [shape: bf16[128,128], index: 5, kind: input, shape index: {}]   ;;  %s3035_s6 = inlined_call_operand.hbm [shape: bf16[128,128], index: 6, kind: input, shape index: {}]   ;;  %s3036_s7 = inlined_call_operand.hbm [shape: bf16[128,128], index: 7, kind: input, shape index: {}]   ;;  %s3037_s8 = inlined_call_operand.hbm [shape: bf16[128,256], index: 8, kind: input, shape index: {}]   ;;  %s3038_s9 = inlined_call_operand.hbm [shape: bf16[256,128], index: 9, kind: input, shape index: {}]   ;;  %s3039_s10 = inlined_call_operand.vmem [shape: f32[1,128], index: 10, kind: input, shape index: {}]   ;;  %s3040_s11 = inlined_call_operand.vmem [shape: f32[1,128], index: 11, kind: input, shape index: {}]   ;;  %s3041_s12 = inlined_call_operand.vmem [shape: f32[1,128], index: 12, kind: input, shape index: {}]   ;;  %s3042_s13 = inlined_call_operand.vmem [shape: f32[1,256], index: 13, kind: input, shape index: {}]   ;;  %s3043_s14 = inlined_call_operand.vmem [shape: f32[1,128], index: 14, kind: input, shape index: {}]   ;;  %s3044_s15 = inlined_call_operand.vmem [shape: f32[1,128], index: 15, kind: input, shape index: {}]   ;;  %s3045_s16 = inlined_call_operand.vmem [shape: f32[1,128], index: 16, kind: input, shape index: {}]   ;;  %s3046_s17 = inlined_call_operand.hbm [shape: f32[2,8,128], index: 17, kind: output, shape index: {}]  }
   0x1   :  { %3047 = sst [smem:[#allocation27_spill]] %s3029_s0 }
   0x2   :  { %3048 = sst [smem:[#allocation28_spill]] %s3030_s1 }
   0x3   :  { %22 = vsyncpa [#allocation3], 0 }
   0x4   :  { %23 = vsyncpa [#allocation6], 0 }
   0x5   :  { %24 = vsyncpa [#allocation9], 0 }
   0x6   :  { %25 = vsyncpa [#allocation12], 0 }
   0x7   :  { %26 = vsyncpa [#allocation15], 0 }
   0x8   :  { %27 = vsyncpa [#allocation18], 0 }
   0x9   :  { %28 = vsyncpa [#allocation4], 0  ;;  %s2564_s24 = smov [#allocation5]   ;;  %s2565_s26 = smov [#allocation8]  }
   0xa   :  { %s46_s25 = sshll.u32 %s2564_s24, 4  ;;  %s70_s27 = sshll.u32 %s2565_s26, 4  ;;  %s47_s25 = int_to_ptr.vmem [resolvable:$true] %s46_s25  ;;  %s71_s27 = int_to_ptr.vmem [resolvable:$true] %s70_s27 }
   0xb   :  { %s2338_s28 = scalar_lea.vmem %s47_s25, 256  ;;  %p2343_p1 = scmp.lt.s32.totalorder %s47_s25, %s47_s25 }
   0xc   :  { %p2339_p0 = scmp.ne.s32.totalorder %s47_s25, %s2338_s28  ;;  %p2344_p2 = scmp.lt.s32.totalorder %s2338_s28, %s2338_s28 }
   0xe   :  { %p2345_p3 = por %p2344_p2, %p2343_p1 }
  0x10   :  { %p2346_p4 = pnand %p2345_p3, %p2339_p0 }
  0x12   :  { %2349 = shalt.err (!%p2346_p4)
}
  0x13   :  { %s2566_s29 = smov 128   ;;  %s2567_s0 = smov 8  }
  0x14   :  { %s3049_s19 = sld [smem:[#allocation28_spill]]  ;;  %s2358_s1 = scalar_lea.vmem %s71_s27, 1024 }
  0x15   :  { %p2359_p5 = scmp.ne.s32.totalorder %s71_s27, %s2358_s1  ;;  %p2363_p6 = scmp.lt.s32.totalorder %s71_s27, %s71_s27 }
  0x16   :  { %p2364_p7 = scmp.lt.s32.totalorder %s2358_s1, %s2358_s1 }
  0x18   :  { %p2365_p8 = por %p2364_p7, %p2363_p6 }
  0x1a   :  { %52 = dma.hbm_to_vmem [thread:$0]  %s3049_s19, 256, %s47_s25, [#allocation6], %s2566_s29, %s2566_s29, %s2567_s0  }
  0x1b   :  { %p2366_p9 = pnand %p2365_p8, %p2359_p5 }
  0x1d   :  { %2369 = shalt.err (!%p2366_p9)
}
  0x1e   :  { %s2568_s20 = smov 64   ;;  %s2569_s21 = smov 4  }
  0x1f   :  { %76 = dma.hbm_to_vmem [thread:$0]  %s3032_s3, 1024, %s71_s27, [#allocation9], %s2568_s20, %s2568_s20, %s2569_s21  }
  0x20   :  { %s2570_s24 = smov [#allocation11]   ;;  %s2571_s28 = smov [#allocation14]  }
  0x21   :  { %s94_s26 = sshll.u32 %s2570_s24, 4  ;;  %s118_s25 = sshll.u32 %s2571_s28, 4  ;;  %s95_s26 = int_to_ptr.vmem [resolvable:$true] %s94_s26  ;;  %s119_s25 = int_to_ptr.vmem [resolvable:$true] %s118_s25 }
  0x22   :  { %s2378_s30 = scalar_lea.vmem %s95_s26, 1024  ;;  %p2383_p11 = scmp.lt.s32.totalorder %s95_s26, %s95_s26 }
  0x23   :  { %p2379_p10 = scmp.ne.s32.totalorder %s95_s26, %s2378_s30  ;;  %p2384_p12 = scmp.lt.s32.totalorder %s2378_s30, %s2378_s30 }
  0x25   :  { %p2385_p13 = por %p2384_p12, %p2383_p11 }
  0x27   :  { %p2386_p0 = pnand %p2385_p13, %p2379_p10 }
  0x29   :  { %2389 = shalt.err (!%p2386_p0)
}
  0x2a   :  { %100 = dma.hbm_to_vmem [thread:$0]  %s3034_s5, 1024, %s95_s26, [#allocation12], %s2568_s20, %s2568_s20, %s2569_s21  }
  0x2b   :  { %s2398_s3 = scalar_lea.vmem %s119_s25, 1024  ;;  %p2403_p2 = scmp.lt.s32.totalorder %s119_s25, %s119_s25 }
  0x2c   :  { %p2399_p1 = scmp.ne.s32.totalorder %s119_s25, %s2398_s3  ;;  %p2404_p3 = scmp.lt.s32.totalorder %s2398_s3, %s2398_s3 }
  0x2e   :  { %p2405_p4 = por %p2404_p3, %p2403_p2 }
  0x30   :  { %p2406_p5 = pnand %p2405_p4, %p2399_p1 }
  0x32   :  { %2409 = shalt.err (!%p2406_p5)
}
  0x33   :  { %124 = dma.hbm_to_vmem [thread:$0]  %s3036_s7, 1024, %s119_s25, [#allocation15], %s2568_s20, %s2568_s20, %s2569_s21  }
  0x34   :  { %s2572_s22 = smov [#allocation2]   ;;  %s2573_s24 = smov [#allocation7]  }
  0x35   :  { %s34_s23 = sshll.u32 %s2572_s22, 4  ;;  %s58_s28 = sshll.u32 %s2573_s24, 4  ;;  %s35_s23 = int_to_ptr.vmem [resolvable:$true] %s34_s23  ;;  %s59_s28 = int_to_ptr.vmem [resolvable:$true] %s58_s28 }
  0x36   :  { %s2418_s5 = scalar_lea.vmem %s35_s23, 256  ;;  %p2423_p7 = scmp.lt.s32.totalorder %s35_s23, %s35_s23 }
  0x37   :  { %p2419_p6 = scmp.ne.s32.totalorder %s35_s23, %s2418_s5  ;;  %p2424_p8 = scmp.lt.s32.totalorder %s2418_s5, %s2418_s5 }
  0x39   :  { %p2425_p9 = por %p2424_p8, %p2423_p7 }
  0x3b   :  { %p2426_p10 = pnand %p2425_p9, %p2419_p6 }
  0x3d   :  { %2429 = shalt.err (!%p2426_p10)
}
  0x3e   :  { %s3050_s18 = sld [smem:[#allocation27_spill]]  ;;  %s2438_s7 = scalar_lea.vmem %s59_s28, 256 }
  0x3f   :  { %p2439_p11 = scmp.ne.s32.totalorder %s59_s28, %s2438_s7  ;;  %p2443_p12 = scmp.lt.s32.totalorder %s59_s28, %s59_s28 }
  0x40   :  { %p2444_p13 = scmp.lt.s32.totalorder %s2438_s7, %s2438_s7 }
  0x42   :  { %p2445_p0 = por %p2444_p13, %p2443_p12 }
  0x44   :  { %40 = dma.hbm_to_vmem [thread:$0]  %s3050_s18, 256, %s35_s23, [#allocation3], %s2566_s29, %s2566_s29, %s2567_s0  }
  0x45   :  { %p2446_p1 = pnand %p2445_p0, %p2439_p11 }
  0x47   :  { %2449 = shalt.err (!%p2446_p1)
}
  0x48   :  { %64 = dma.hbm_to_vmem [thread:$0]  %s3031_s2, 256, %s59_s28, [#allocation6], %s2566_s29, %s2566_s29, %s2567_s0  }
  0x49   :  { %s2574_s3 = smov [#allocation10]   ;;  %s2575_s1 = smov [#allocation13]  }
  0x4a   :  { %s82_s27 = sshll.u32 %s2574_s3, 4  ;;  %s106_s22 = sshll.u32 %s2575_s1, 4  ;;  %s83_s27 = int_to_ptr.vmem [resolvable:$true] %s82_s27  ;;  %s107_s22 = int_to_ptr.vmem [resolvable:$true] %s106_s22 }
  0x4b   :  { %s2458_s23 = scalar_lea.vmem %s83_s27, 1024  ;;  %p2463_p3 = scmp.lt.s32.totalorder %s83_s27, %s83_s27 }
  0x4c   :  { %p2459_p2 = scmp.ne.s32.totalorder %s83_s27, %s2458_s23  ;;  %p2464_p4 = scmp.lt.s32.totalorder %s2458_s23, %s2458_s23 }
  0x4e   :  { %p2465_p5 = por %p2464_p4, %p2463_p3 }
  0x50   :  { %p2466_p6 = pnand %p2465_p5, %p2459_p2 }
  0x52   :  { %2469 = shalt.err (!%p2466_p6)
}
  0x53   :  { %88 = dma.hbm_to_vmem [thread:$0]  %s3033_s4, 1024, %s83_s27, [#allocation9], %s2568_s20, %s2568_s20, %s2569_s21  }
  0x54   :  { %s2478_s2 = scalar_lea.vmem %s107_s22, 1024  ;;  %p2483_p8 = scmp.lt.s32.totalorder %s107_s22, %s107_s22 }
  0x55   :  { %p2479_p7 = scmp.ne.s32.totalorder %s107_s22, %s2478_s2  ;;  %p2484_p9 = scmp.lt.s32.totalorder %s2478_s2, %s2478_s2 }
  0x57   :  { %p2485_p10 = por %p2484_p9, %p2483_p8 }
  0x59   :  { %p2486_p11 = pnand %p2485_p10, %p2479_p7 }
  0x5b   :  { %2489 = shalt.err (!%p2486_p11)
}
  0x5c   :  { %112 = dma.hbm_to_vmem [thread:$0]  %s3035_s6, 1024, %s107_s22, [#allocation12], %s2568_s20, %s2568_s20, %s2569_s21  }
  0x5d   :  { %s2576_s30 = smov [#allocation16]   ;;  %s2577_s7 = smov [#allocation17]  }
  0x5e   :  { %s130_s18 = sshll.u32 %s2576_s30, 4  ;;  %s142_s25 = sshll.u32 %s2577_s7, 4  ;;  %s131_s18 = int_to_ptr.vmem [resolvable:$true] %s130_s18  ;;  %s143_s25 = int_to_ptr.vmem [resolvable:$true] %s142_s25 }
  0x5f   :  { %s2498_s4 = scalar_lea.vmem %s131_s18, 2048  ;;  %p2503_p13 = scmp.lt.s32.totalorder %s131_s18, %s131_s18 }
  0x60   :  { %p2499_p12 = scmp.ne.s32.totalorder %s131_s18, %s2498_s4  ;;  %p2504_p0 = scmp.lt.s32.totalorder %s2498_s4, %s2498_s4 }
  0x62   :  { %p2505_p1 = por %p2504_p0, %p2503_p13 }
  0x64   :  { %p2506_p2 = pnand %p2505_p1, %p2499_p12 }
  0x66   :  { %2509 = shalt.err (!%p2506_p2)
}
  0x67   :  { %136 = dma.hbm_to_vmem [thread:$0]  %s3037_s8, 2048, %s131_s18, [#allocation15], %s2566_s29, %s2566_s29, %s2567_s0  }
  0x68   :  { %s2518_s6 = scalar_lea.vmem %s143_s25, 2048  ;;  %p2523_p4 = scmp.lt.s32.totalorder %s143_s25, %s143_s25 }
  0x69   :  { %p2519_p3 = scmp.ne.s32.totalorder %s143_s25, %s2518_s6  ;;  %p2524_p5 = scmp.lt.s32.totalorder %s2518_s6, %s2518_s6 }
  0x6b   :  { %p2525_p6 = por %p2524_p5, %p2523_p4 }
  0x6d   :  { %p2526_p7 = pnand %p2525_p6, %p2519_p3 }
  0x6f   :  { %2529 = shalt.err (!%p2526_p7)
}
  0x70   :  { %148 = dma.hbm_to_vmem [thread:$0]  %s3038_s9, 2048, %s143_s25, [#allocation18], %s2568_s20, %s2568_s20, %s2569_s21  }
  0x71   :  { %2550 = dma.done.wait [#allocation3], 256  }
  0x72   :  { %2551 = vsyncadd [#allocation3], 4294967040 }
  0x73   :  { %2552 = dma.done.wait [#allocation6], 512  }
  0x74   :  { %2553 = vsyncadd [#allocation6], 4294966784 }
  0x75   :  { %2554 = dma.done.wait [#allocation9], 2048  }
  0x76   :  { %2555 = vsyncadd [#allocation9], 4294965248 }
  0x77   :  { %2556 = dma.done.wait [#allocation12], 2048  }
  0x78   :  { %2557 = vsyncadd [#allocation12], 4294965248 }
  0x79   :  { %2558 = dma.done.wait [#allocation15], 3072  }
  0x7a   :  { %2559 = vsyncadd [#allocation15], 4294964224 }
  0x7b   :  { %2560 = dma.done.wait [#allocation18], 2048  }
  0x7c   :  { %2561 = vsyncadd [#allocation18], 4294965248  ;;  %v2578_v0 = vmov 0.0   ;;  %vm2579_vm0 = vmmov 0   ;;  %v2176_v1 = vld [vmem:[#allocation8 + $0x38] sm:$0xff]   ;;  %v2178_v3 = vld [vmem:[#allocation8 + $0x30] sm:$0xff]   ;;  %v524_v44 = vlaneseq }
  0x7d   :  { %2045 = vmatprep.subr.bf16.mxu0 %v2578_v0  ;;  %2065 = vmatprep.subr.bf16.mxu1 %v2578_v0  ;;  %v2177_v2 = vld [vmem:[#allocation10 + $0x38] sm:$0xff]   ;;  %v2179_v4 = vld [vmem:[#allocation10 + $0x30] sm:$0xff]   ;;  %v2180_v5 = vld [vmem:[#allocation8 + $0x28] sm:$0xff]   ;;  %v2580_v42 = vmov 1966171168   ;;  %vm1338_vm1 = vcmask 1041409  }
  0x7e   :  { %2061 = vmatprep.mubr.msk.bf16.mxu0 %vm2579_vm0, %v2578_v0  ;;  %2081 = vmatprep.mubr.msk.bf16.mxu1 %vm2579_vm0, %v2578_v0  ;;  %v2181_v6 = vld [vmem:[#allocation10 + $0x28] sm:$0xff]   ;;  %v2182_v7 = vld [vmem:[#allocation8 + $0x20] sm:$0xff]   ;;  %v2184_v9 = vld [vmem:[#allocation8 + $0x18] sm:$0xff]   ;;  %v522_v43 = vunpack.c.l.s4 %v2580_v42  ;;  %v2766_v46 = vshrl.u32 %v524_v44, 7  ;;  %vm1340_vm2 = vcmask 1042434   ;;  %vm1342_vm3 = vcmask 1043459  }
  0x7f   :  { %2046 = vmatpush3.bf16.msra.mxu0 %v2176_v1  ;;  %2066 = vmatpush3.bf16.msra.mxu1 %v2177_v2  ;;  %v2183_v8 = vld [vmem:[#allocation10 + $0x20] sm:$0xff]   ;;  %v2185_v10 = vld [vmem:[#allocation10 + $0x18] sm:$0xff]   ;;  %v2186_v11 = vld [vmem:[#allocation8 + $0x10] sm:$0xff]   ;;  %vm1344_vm4 = vcmask 1044484   ;;  %vm1346_vm5 = vcmask 1045509   ;;  %vm1348_vm6 = vcmask 1046534  }
  0x80   :  { %2047 = vmatprep.subr.bf16.mxu0 %v2578_v0  ;;  %2067 = vmatprep.subr.bf16.mxu1 %v2578_v0  ;;  %v2187_v12 = vld [vmem:[#allocation10 + $0x10] sm:$0xff]   ;;  %v2188_v13 = vld [vmem:[#allocation8 + $0x8] sm:$0xff]   ;;  %v2190_v15 = vld [vmem:[#allocation8] sm:$0xff]   ;;  %v523_v45 = vunpack.c.0.s8 %v522_v43  ;;  %v2770_v56 = vsub.s32 0, %v2766_v46  ;;  %vm1350_vm7 = vcmask 1047559   ;;  %s2582_s28 = smov [#allocation19]  }
  0x81   :  { %v2189_v14 = vld [vmem:[#allocation10 + $0x8] sm:$0xff]   ;;  %v194_v16 = vld [vmem:[#allocation7] sm:$0xff]  ;;  %v195_v17 = vld [vmem:[#allocation7 + $0x8] sm:$0xff]  ;;  %s1876_s26 = sshll.u32 %s2582_s28, 4  ;;  %s1877_s26 = int_to_ptr.vmem [resolvable:$true] %s1876_s26 }
  0x82   :  { %v2191_v18 = vld [vmem:[#allocation10] sm:$0xff]   ;;  %v197_v20 = vld [vmem:[#allocation5 + $0x8] sm:$0xff]  ;;  %v2192_v21 = vld [vmem:[#allocation14 + $0x38] sm:$0xff]   ;;  %v200_v22 = vpack.c.bf16 %v195_v17, %v194_v16  ;;  %v526_v47 = vsub.s32 %v523_v45, %v2766_v46  ;;  %s2530_s30 = scalar_lea.vmem %s1877_s26, 256  ;;  %p2535_p9 = scmp.lt.s32.totalorder %s1877_s26, %s1877_s26 }
  0x83   :  { %2048 = vmatpush3.bf16.msra.mxu0 %v2178_v3  ;;  %2068 = vmatpush3.bf16.msra.mxu1 %v2179_v4  ;;  %v196_v19 = vld [vmem:[#allocation5] sm:$0xff]  ;;  %v2193_v24 = vld [vmem:[#allocation14 + $0x30] sm:$0xff]   ;;  %v2194_v25 = vld [vmem:[#allocation14 + $0x28] sm:$0xff]   ;;  %p2531_p8 = scmp.ne.s32.totalorder %s1877_s26, %s2530_s30  ;;  %p2536_p10 = scmp.lt.s32.totalorder %s2530_s30, %s2530_s30 }
  0x84   :  { %2049 = vmatprep.subr.bf16.mxu0 %v2578_v0  ;;  %2069 = vmatprep.subr.bf16.mxu1 %v2578_v0  ;;  %v306_v23 = vpack.c.bf16 %v197_v20, %v196_v19  ;;  %v2195_v26 = vld [vmem:[#allocation14 + $0x20] sm:$0xff]   ;;  %v2196_v27 = vld [vmem:[#allocation14 + $0x18] sm:$0xff]   ;;  %v2197_v28 = vld [vmem:[#allocation14 + $0x10] sm:$0xff]  }
  0x85   :  { %v2198_v29 = vld [vmem:[#allocation14 + $0x8] sm:$0xff]   ;;  %v2199_v30 = vld [vmem:[#allocation14] sm:$0xff]   ;;  %v2200_v31 = vld [vmem:[#allocation11 + $0x38] sm:$0xff]   ;;  %p2537_p11 = por %p2536_p10, %p2535_p9 }
  0x86   :  { %v2201_v32 = vld [vmem:[#allocation11 + $0x30] sm:$0xff]   ;;  %v2202_v33 = vld [vmem:[#allocation11 + $0x28] sm:$0xff]   ;;  %v2203_v34 = vld [vmem:[#allocation11 + $0x20] sm:$0xff]  }
  0x87   :  { %2050 = vmatpush3.bf16.msra.mxu0 %v2180_v5  ;;  %2070 = vmatpush3.bf16.msra.mxu1 %v2181_v6  ;;  %v2204_v35 = vld [vmem:[#allocation11 + $0x18] sm:$0xff]   ;;  %v2205_v36 = vld [vmem:[#allocation11 + $0x10] sm:$0xff]   ;;  %v2206_v37 = vld [vmem:[#allocation11 + $0x8] sm:$0xff]   ;;  %p2538_p12 = pnand %p2537_p11, %p2531_p8 }
  0x88   :  { %2051 = vmatprep.subr.bf16.mxu0 %v2578_v0  ;;  %2071 = vmatprep.subr.bf16.mxu1 %v2578_v0  ;;  %v2207_v38 = vld [vmem:[#allocation11] sm:$0xff]   ;;  %v198_v39 = vld [vmem:[#allocation2] sm:$0xff]  ;;  %v199_v40 = vld [vmem:[#allocation2 + $0x8] sm:$0xff] }
  0x89   :  { %v412_v41 = vpack.c.bf16 %v199_v40, %v198_v39 }
  0x8b   :  { %2052 = vmatpush3.bf16.msra.mxu0 %v2182_v7  ;;  %2072 = vmatpush3.bf16.msra.mxu1 %v2183_v8 }
  0x8c   :  { %2053 = vmatprep.subr.bf16.mxu0 %v2578_v0  ;;  %2073 = vmatprep.subr.bf16.mxu1 %v2578_v0 }
  0x8f   :  { %2054 = vmatpush3.bf16.msra.mxu0 %v2184_v9  ;;  %2074 = vmatpush3.bf16.msra.mxu1 %v2185_v10 }
  0x90   :  { %2055 = vmatprep.subr.bf16.mxu0 %v2578_v0  ;;  %2075 = vmatprep.subr.bf16.mxu1 %v2578_v0 }
  0x93   :  { %2056 = vmatpush3.bf16.msra.mxu0 %v2186_v11  ;;  %2076 = vmatpush3.bf16.msra.mxu1 %v2187_v12 }
  0x94   :  { %2057 = vmatprep.subr.bf16.mxu0 %v2578_v0  ;;  %2077 = vmatprep.subr.bf16.mxu1 %v2578_v0 }
  0x97   :  { %2058 = vmatpush3.bf16.msra.mxu0 %v2188_v13  ;;  %2078 = vmatpush3.bf16.msra.mxu1 %v2189_v14 }
  0x98   :  { %2059 = vmatprep.subr.bf16.mxu0 %v2578_v0  ;;  %2079 = vmatprep.subr.bf16.mxu1 %v2578_v0 }
  0x9b   :  { %2060 = vmatpush3.bf16.msra.mxu0 %v2190_v15  ;;  %2080 = vmatpush3.bf16.msra.mxu1 %v2191_v18 }
  0x9c   :  { %2085 = vmatprep.subr.bf16.mxu0 %v2578_v0  ;;  %2105 = vmatprep.subr.bf16.mxu1 %v2192_v21 }
  0x9e   :  { %2062 = vmatmul.mubr.bf16.vlgmr.msra.gmra.mxu0 %v200_v22  ;;  %2082 = vmatmul.mubr.bf16.vlgmr.msra.gmra.mxu1 %v306_v23 }
  0x9f   :  { %2101 = vmatprep.mubr.msk.bf16.mxu0 %vm2579_vm0, %v2578_v0  ;;  %2106 = vmatpush3.bf16.msra.mxu1 %v2192_v21 }
  0xa0   :  { %2107 = vmatprep.subr.bf16.mxu1 %v2193_v24  ;;  %2086 = vmatpush3.bf16.msra.mxu0 %v2200_v31 }
  0xa1   :  { %2087 = vmatprep.subr.bf16.mxu0 %v2578_v0 }
  0xa3   :  { %2108 = vmatpush3.bf16.msra.mxu1 %v2193_v24 }
  0xa4   :  { %2109 = vmatprep.subr.bf16.mxu1 %v2194_v25  ;;  %2088 = vmatpush3.bf16.msra.mxu0 %v2201_v32 }
  0xa5   :  { %2089 = vmatprep.subr.bf16.mxu0 %v2578_v0 }
  0xa7   :  { %2110 = vmatpush3.bf16.msra.mxu1 %v2194_v25 }
  0xa8   :  { %2111 = vmatprep.subr.bf16.mxu1 %v2195_v26  ;;  %2090 = vmatpush3.bf16.msra.mxu0 %v2202_v33 }
  0xa9   :  { %2091 = vmatprep.subr.bf16.mxu0 %v2578_v0 }
  0xab   :  { %2112 = vmatpush3.bf16.msra.mxu1 %v2195_v26 }
  0xac   :  { %2113 = vmatprep.subr.bf16.mxu1 %v2196_v27  ;;  %2092 = vmatpush3.bf16.msra.mxu0 %v2203_v34 }
  0xad   :  { %2093 = vmatprep.subr.bf16.mxu0 %v2578_v0 }
  0xaf   :  { %2114 = vmatpush3.bf16.msra.mxu1 %v2196_v27 }
  0xb0   :  { %2115 = vmatprep.subr.bf16.mxu1 %v2197_v28  ;;  %2094 = vmatpush3.bf16.msra.mxu0 %v2204_v35 }
  0xb1   :  { %2095 = vmatprep.subr.bf16.mxu0 %v2578_v0 }
  0xb3   :  { %2116 = vmatpush3.bf16.msra.mxu1 %v2197_v28 }
  0xb4   :  { %2117 = vmatprep.subr.bf16.mxu1 %v2198_v29  ;;  %2096 = vmatpush3.bf16.msra.mxu0 %v2205_v36 }
  0xb5   :  { %2097 = vmatprep.subr.bf16.mxu0 %v2578_v0 }
  0xb7   :  { %2118 = vmatpush3.bf16.msra.mxu1 %v2198_v29 }
  0xb8   :  { %2119 = vmatprep.subr.bf16.mxu1 %v2199_v30  ;;  %2098 = vmatpush3.bf16.msra.mxu0 %v2206_v37 }
  0xb9   :  { %2099 = vmatprep.subr.bf16.mxu0 %v2578_v0 }
  0xbb   :  { %2120 = vmatpush3.bf16.msra.mxu1 %v2199_v30 }
  0xbc   :  { %2100 = vmatpush3.bf16.msra.mxu0 %v2207_v38 }
  0xbd   :  { %2137 = vmatprep.subr.bf16.mxu0 %v2578_v0 }
  0xbf   :  { %2102 = vmatmul.mubr.bf16.vlgmr.msra.gmra.mxu0 %v412_v41 }
  0xc0   :  { %2153 = vmatprep.mubr.msk.bf16.mxu0 %vm2579_vm0, %v2578_v0 }
 0x15e   :  { %v299_v48 = vpop.f32.mrf.mxu0  ;;  %v405_v51 = vpop.f32.mrf.mxu1 }
 0x15f   :  { %v520_v49 = vcombine.high %v299_v48, %v299_v48  ;;  %v527_v50 = vrot.slane %v299_v48, %v526_v47 }
 0x160   :  { %v2063_v52 = vpop.f32.mrf.mxu0  ;;  %v2083_v57 = vpop.f32.mrf.mxu1 }
 0x161   :  { %v534_v53 = vrot.slane %v520_v49, %v526_v47  ;;  %v535_v54 = vcombine.high %v527_v50, %v527_v50  ;;  %v543_v55 = vrot.slane %v527_v50, %v526_v47 }
 0x162   :  { %v302_v58 = vpop.f32.mrf.mxu0  ;;  %v2772_v62 = vpop.f32.mrf.mxu1 }
 0x163   :  { %v536_v59 = vcombine.high %v534_v53, %v534_v53  ;;  %v557_v60 = vrot.slane %v535_v54, %v526_v47  ;;  %v565_v61 = vcombine.high %v543_v55, %v543_v55  ;;  %v569_v63 = vcombine.high %v302_v58, %v302_v58 }
 0x164   :  { %v576_v1 = vrot.slane %v302_v58, %v526_v47  ;;  %v2064_v2 = vpop.f32.mrf.mxu0  ;;  %v621_v5 = vrot.slane %v543_v55, %v2770_v56  ;;  %v2084_v7 = vpop.f32.mrf.mxu1  ;;  %v550_v8 = vrot.slane %v534_v53, %v526_v47 }
 0x165   :  { %v564_v3 = vrot.slane %v536_v59, %v526_v47  ;;  %v567_v4 = vcombine.high %v557_v60, %v557_v60  ;;  %v625_v6 = vrot.slane %v557_v60, %v2770_v56  ;;  %v629_v9 = vrot.slane %v565_v61, %v2770_v56  ;;  %v2212_v7 = vld [vmem:[#allocation13 + $0x18] sm:$0xff]  }
 0x166   :  { %v584_v10 = vcombine.high %v576_v1, %v576_v1  ;;  %v583_v13 = vrot.slane %v569_v63, %v526_v47  ;;  %v698_v16 = vmul.f32 %v621_v5, %v405_v51  ;;  %v566_v19 = vcombine.high %v550_v8, %v550_v8  ;;  %v2209_v5 = vld [vmem:[#allocation13 + $0x30] sm:$0xff]  }
 0x167   :  { %v633_v11 = vrot.slane %v567_v4, %v2770_v56  ;;  %v568_v12 = vcombine.high %v564_v3, %v564_v3  ;;  %v699_v14 = vmul.f32 %v625_v6, %v405_v51  ;;  %v700_v17 = vmul.f32 %v629_v9, %v405_v51  ;;  %v2208_v4 = vld [vmem:[#allocation13 + $0x38] sm:$0xff]   ;;  %v2210_v6 = vld [vmem:[#allocation13 + $0x28] sm:$0xff]  }
 0x168   :  { %v606_v15 = vrot.slane %v584_v10, %v526_v47  ;;  %v637_v20 = vrot.slane %v550_v8, %v2770_v56  ;;  %v592_v21 = vrot.slane %v576_v1, %v526_v47  ;;  %v641_v24 = vrot.slane %v564_v3, %v2770_v56  ;;  %2138 = vmatpush3.bf16.msra.mxu0 %v2208_v4  ;;  %v2213_v8 = vld [vmem:[#allocation13 + $0x10] sm:$0xff]   ;;  %v2214_v9 = vld [vmem:[#allocation13 + $0x8] sm:$0xff]   ;;  %v2215_v10 = vld [vmem:[#allocation13] sm:$0xff]  }
 0x169   :  { %v701_v18 = vmul.f32 %v633_v11, %v405_v51  ;;  %v714_v22 = vpack.c.bf16 %v699_v14, %v698_v16  ;;  %v585_v25 = vcombine.high %v583_v13, %v583_v13  ;;  %v649_v27 = vrot.slane %v568_v12, %v2770_v56  ;;  %2139 = vmatprep.subr.bf16.mxu0 %v2578_v0 }
 0x16a   :  { %v657_v26 = vrot.slane %v606_v15, %v2770_v56  ;;  %v702_v28 = vmul.f32 %v637_v20, %v405_v51  ;;  %v703_v29 = vmul.f32 %v641_v24, %v405_v51  ;;  %v645_v30 = vrot.slane %v566_v19, %v2770_v56 }
 0x16b   :  { %v715_v23 = vpack.c.bf16 %v701_v18, %v700_v17  ;;  %2121 = vmatprep.mubr.bf16.mxu1 %v714_v22  ;;  %v653_v31 = vrot.slane %v592_v21, %v2770_v56  ;;  %v616_v32 = vcombine.high %v606_v15, %v606_v15  ;;  %v705_v34 = vmul.f32 %v649_v27, %v405_v51 }
 0x16c   :  { %v716_v33 = vpack.c.bf16 %v703_v29, %v702_v28  ;;  %v613_v35 = vrot.slane %v585_v25, %v526_v47  ;;  %v707_v36 = vmul.f32 %v657_v26, %v2772_v62  ;;  %v614_v37 = vcombine.high %v592_v21, %v592_v21  ;;  %2140 = vmatpush3.bf16.msra.mxu0 %v2209_v5 }
 0x16d   :  { %2122 = vmatmul.mubr.bf16.vlgmr.msra.gmra.mxu1 %v715_v23  ;;  %v704_v38 = vmul.f32 %v645_v30, %v405_v51  ;;  %v599_v39 = vrot.slane %v583_v13, %v526_v47  ;;  %v706_v40 = vmul.f32 %v653_v31, %v2772_v62  ;;  %v665_v42 = vrot.slane %v616_v32, %v2770_v56 }
 0x16e   :  { %2125 = vmatprep.mubr.bf16.mxu1 %v716_v33  ;;  %v673_v44 = vrot.slane %v613_v35, %v2770_v56  ;;  %v661_v45 = vrot.slane %v614_v37, %v2770_v56  ;;  %v617_v49 = vcombine.high %v613_v35, %v613_v35  ;;  %2141 = vmatprep.subr.bf16.mxu0 %v2578_v0 }
 0x16f   :  { %v717_v41 = vpack.c.bf16 %v705_v34, %v704_v38  ;;  %v718_v43 = vpack.c.bf16 %v707_v36, %v706_v40  ;;  %v669_v48 = vrot.slane %v599_v39, %v2770_v56  ;;  %v709_v50 = vmul.f32 %v665_v42, %v2772_v62 }
 0x170   :  { %v711_v51 = vmul.f32 %v673_v44, %v2772_v62  ;;  %v615_v47 = vcombine.high %v599_v39, %v599_v39  ;;  %v708_v52 = vmul.f32 %v661_v45, %v2772_v62  ;;  %v681_v55 = vrot.slane %v617_v49, %v2770_v56  ;;  %2142 = vmatpush3.bf16.msra.mxu0 %v2210_v6 }
 0x171   :  { %v710_v53 = vmul.f32 %v669_v48, %v2772_v62  ;;  %2143 = vmatprep.subr.bf16.mxu0 %v2578_v0 }
 0x172   :  { %v719_v54 = vpack.c.bf16 %v709_v50, %v708_v52  ;;  %v677_v58 = vrot.slane %v615_v47, %v2770_v56  ;;  %v713_v59 = vmul.f32 %v681_v55, %v2772_v62 }
 0x173   :  { %v720_v57 = vpack.c.bf16 %v711_v51, %v710_v53 }
 0x174   :  { %v712_v60 = vmul.f32 %v677_v58, %v2772_v62  ;;  %v2211_v62 = vld [vmem:[#allocation13 + $0x20] sm:$0xff]  }
 0x175   :  { %2126 = vmatmul.mubr.bf16.gmra.mxu1 %v717_v41  ;;  %2144 = vmatpush3.bf16.msra.mxu0 %v2211_v62 }
 0x176   :  { %2129 = vmatprep.mubr.bf16.mxu1 %v718_v43  ;;  %v721_v61 = vpack.c.bf16 %v713_v59, %v712_v60  ;;  %2145 = vmatprep.subr.bf16.mxu0 %v2578_v0 }
 0x179   :  { %2146 = vmatpush3.bf16.msra.mxu0 %v2212_v7 }
 0x17a   :  { %2147 = vmatprep.subr.bf16.mxu0 %v2578_v0 }
 0x17d   :  { %2130 = vmatmul.mubr.bf16.gmra.mxu1 %v719_v54  ;;  %2148 = vmatpush3.bf16.msra.mxu0 %v2213_v8 }
 0x17e   :  { %2133 = vmatprep.mubr.bf16.mxu1 %v720_v57  ;;  %2149 = vmatprep.subr.bf16.mxu0 %v2578_v0 }
 0x17f   :  { %v2798_v63 = vpop.f32.mrf.mxu0 }
 0x181   :  { %v2103_v1 = vpop.f32.mrf.mxu0  ;;  %2150 = vmatpush3.bf16.msra.mxu0 %v2214_v9 }
 0x182   :  { %2151 = vmatprep.subr.bf16.mxu0 %v2578_v0 }
 0x183   :  { %v2800_v2 = vpop.f32.mrf.mxu0 }
 0x185   :  { %2134 = vmatmul.mubr.bf16.gmra.mxu1 %v721_v61  ;;  %v2104_v3 = vpop.f32.mrf.mxu0  ;;  %2152 = vmatpush3.bf16.msra.mxu0 %v2215_v10 }
 0x22d   :  { %v2123_v11 = vpop.f32.mrf.mxu1 }
 0x22e   :  { %v895_v12 = vrot.slane %v2123_v11, 4 }
 0x22f   :  { %v820_v13 = vpop.f32.mrf.mxu1 }
 0x230   :  { %v896_v14 = vmax.f32 %v2123_v11, %v895_v12  ;;  %v883_v15 = vrot.slane %v820_v13, 4 }
 0x231   :  { %v2124_v16 = vpop.f32.mrf.mxu1 }
 0x232   :  { %v897_v17 = vrot.slane %v896_v14, 2  ;;  %v884_v18 = vmax.f32 %v820_v13, %v883_v15  ;;  %v901_v19 = vrot.slane %v2124_v16, 4 }
 0x233   :  { %v823_v20 = vpop.f32.mrf.mxu1 }
 0x234   :  { %v898_v21 = vmax.f32 %v896_v14, %v897_v17  ;;  %v885_v22 = vrot.slane %v884_v18, 2  ;;  %v902_v23 = vmax.f32 %v2124_v16, %v901_v19  ;;  %v889_v24 = vrot.slane %v823_v20, 4 }
 0x235   :  { %v2127_v25 = vpop.f32.mrf.mxu1 }
 0x236   :  { %v899_v26 = vrot.slane %v898_v21, 1  ;;  %v886_v27 = vmax.f32 %v884_v18, %v885_v22  ;;  %v903_v28 = vrot.slane %v902_v23, 2  ;;  %v890_v0 = vmax.f32 %v823_v20, %v889_v24 }
 0x237   :  { %v919_v29 = vrot.slane %v2127_v25, 4  ;;  %v2809_v30 = vpop.f32.mrf.mxu1 }
 0x238   :  { %v900_v31 = vmax.f32 %v898_v21, %v899_v26  ;;  %v887_v32 = vrot.slane %v886_v27, 1  ;;  %v904_v33 = vmax.f32 %v902_v23, %v903_v28  ;;  %v891_v34 = vrot.slane %v890_v0, 2 }
 0x239   :  { %v920_v35 = vmax.f32 %v2127_v25, %v919_v29  ;;  %v907_v36 = vrot.slane %v2809_v30, 4  ;;  %v2812_v37 = vpop.f32.mrf.mxu1 }
 0x23a   :  { %v981_v38 = vsub.f32 %v2123_v11, %v900_v31  ;;  %v888_v39 = vmax.f32 %v886_v27, %v887_v32  ;;  %v905_v40 = vrot.slane %v904_v33, 1  ;;  %v892_v41 = vmax.f32 %v890_v0, %v891_v34 }
 0x23b   :  { %v921_v42 = vrot.slane %v920_v35, 2  ;;  %v908_v43 = vmax.f32 %v2809_v30, %v907_v36  ;;  %v925_v44 = vrot.slane %v2812_v37, 4  ;;  %v2816_v45 = vpop.f32.mrf.mxu1 }
 0x23c   :  { %v999_v48 = vmul.f32 1.442695, %v981_v38  ;;  %v979_v49 = vsub.f32 %v820_v13, %v888_v39  ;;  %v906_v50 = vmax.f32 %v904_v33, %v905_v40  ;;  %v893_v51 = vrot.slane %v892_v41, 1 }
 0x23d   :  { %v922_v47 = vmax.f32 %v920_v35, %v921_v42  ;;  %v909_v52 = vrot.slane %v908_v43, 2  ;;  %v926_v53 = vmax.f32 %v2812_v37, %v925_v44  ;;  %v913_v54 = vrot.slane %v2816_v45, 4  ;;  %v2820_v55 = vpop.f32.mrf.mxu1 }
 0x23e   :  { %2256 = vpow2.f32 %v999_v48  ;;  %v995_v57 = vmul.f32 1.442695, %v979_v49  ;;  %v982_v58 = vsub.f32 %v2124_v16, %v906_v50  ;;  %v894_v59 = vmax.f32 %v892_v41, %v893_v51 }
 0x23f   :  { %v923_v60 = vrot.slane %v922_v47, 1  ;;  %v910_v61 = vmax.f32 %v908_v43, %v909_v52  ;;  %v927_v1 = vrot.slane %v926_v53, 2  ;;  %v914_v3 = vmax.f32 %v2816_v45, %v913_v54  ;;  %v2823_v4 = vpop.f32.mrf.mxu1 }
 0x240   :  { %2258 = vpow2.f32 %v995_v57  ;;  %v1001_v5 = vmul.f32 1.442695, %v982_v58  ;;  %v980_v6 = vsub.f32 %v823_v20, %v894_v59  ;;  %v943_v62 = vrot.slane %v2820_v55, 4 }
 0x241   :  { %v924_v7 = vmax.f32 %v922_v47, %v923_v60  ;;  %v911_v8 = vrot.slane %v910_v61, 1  ;;  %v928_v9 = vmax.f32 %v926_v53, %v927_v1  ;;  %v915_v10 = vrot.slane %v914_v3, 2  ;;  %v2826_v11 = vpop.f32.mrf.mxu1 }
 0x242   :  { %2260 = vpow2.f32 %v1001_v5  ;;  %v997_v12 = vmul.f32 1.442695, %v980_v6  ;;  %v944_v13 = vmax.f32 %v2820_v55, %v943_v62  ;;  %v931_v14 = vrot.slane %v2823_v4, 4 }
 0x243   :  { %v985_v15 = vsub.f32 %v2127_v25, %v924_v7  ;;  %v912_v16 = vmax.f32 %v910_v61, %v911_v8  ;;  %v929_v17 = vrot.slane %v928_v9, 1  ;;  %v916_v18 = vmax.f32 %v914_v3, %v915_v10  ;;  %v2830_v19 = vpop.f32.mrf.mxu1 }
 0x244   :  { %2262 = vpow2.f32 %v997_v12  ;;  %v945_v20 = vrot.slane %v944_v13, 2  ;;  %v932_v21 = vmax.f32 %v2823_v4, %v931_v14  ;;  %v949_v22 = vrot.slane %v2826_v11, 4 }
 0x245   :  { %v1007_v23 = vmul.f32 1.442695, %v985_v15  ;;  %v983_v24 = vsub.f32 %v2809_v30, %v912_v16  ;;  %v930_v26 = vmax.f32 %v928_v9, %v929_v17  ;;  %v917_v27 = vrot.slane %v916_v18, 1  ;;  %v2835_v28 = vpop.f32.mrf.mxu1 }
 0x246   :  { %v946_v0 = vmax.f32 %v944_v13, %v945_v20  ;;  %v933_v25 = vrot.slane %v932_v21, 2  ;;  %v950_v29 = vmax.f32 %v2826_v11, %v949_v22  ;;  %v937_v31 = vrot.slane %v2830_v19, 4 }
 0x247   :  { %2264 = vpow2.f32 %v1007_v23  ;;  %v1003_v32 = vmul.f32 1.442695, %v983_v24  ;;  %v986_v33 = vsub.f32 %v2812_v37, %v930_v26  ;;  %v918_v34 = vmax.f32 %v916_v18, %v917_v27  ;;  %v2841_v39 = vpop.f32.mrf.mxu1 }
 0x248   :  { %v947_v35 = vrot.slane %v946_v0, 1  ;;  %v934_v36 = vmax.f32 %v932_v21, %v933_v25  ;;  %v951_v38 = vrot.slane %v950_v29, 2  ;;  %v938_v30 = vmax.f32 %v2830_v19, %v937_v31 }
 0x249   :  { %2266 = vpow2.f32 %v1003_v32  ;;  %v1009_v40 = vmul.f32 1.442695, %v986_v33  ;;  %v984_v41 = vsub.f32 %v2816_v45, %v918_v34  ;;  %v967_v42 = vrot.slane %v2835_v28, 4  ;;  %v2862_v15 = vpop.f32.mrf.mxu1 }
 0x24a   :  { %v948_v43 = vmax.f32 %v946_v0, %v947_v35  ;;  %v935_v44 = vrot.slane %v934_v36, 1  ;;  %v952_v48 = vmax.f32 %v950_v29, %v951_v38  ;;  %v939_v49 = vrot.slane %v938_v30, 2 }
 0x24b   :  { %v2845_v50 = vpop.eup %2256  ;;  %2268 = vpow2.f32 %v1009_v40  ;;  %v1005_v37 = vmul.f32 1.442695, %v984_v41  ;;  %v968_v51 = vmax.f32 %v2835_v28, %v967_v42  ;;  %v955_v47 = vrot.slane %v2841_v39, 4  ;;  %v2873_v25 = vpop.f32.mrf.mxu1 }
 0x24c   :  { %v989_v52 = vsub.f32 %v2820_v55, %v948_v43  ;;  %v936_v53 = vmax.f32 %v934_v36, %v935_v44  ;;  %v953_v54 = vrot.slane %v952_v48, 1  ;;  %v940_v45 = vmax.f32 %v938_v30, %v939_v49 }
 0x24d   :  { %v2850_v57 = vpop.eup %2258  ;;  %2270 = vpow2.f32 %v1005_v37  ;;  %v969_v58 = vrot.slane %v968_v51, 2  ;;  %v956_v59 = vmax.f32 %v2841_v39, %v955_v47  ;;  %v1039_v60 = vrot.slane %v2845_v50, 4 }
 0x24e   :  { %v1027_v61 = vrot.slane %v2850_v57, 4  ;;  %v1015_v1 = vmul.f32 1.442695, %v989_v52  ;;  %v987_v3 = vsub.f32 %v2823_v4, %v936_v53  ;;  %v954_v6 = vmax.f32 %v952_v48, %v953_v54 }
 0x24f   :  { %v2856_v5 = vpop.eup %2260  ;;  %v941_v55 = vrot.slane %v940_v45, 1  ;;  %v970_v62 = vmax.f32 %v968_v51, %v969_v58  ;;  %v957_v8 = vrot.slane %v956_v59, 2  ;;  %v1040_v4 = vadd.f32 %v2845_v50, %v1039_v60 }
 0x250   :  { %v1028_v7 = vadd.f32 %v2850_v57, %v1027_v61  ;;  %2272 = vpow2.f32 %v1015_v1  ;;  %v1011_v10 = vmul.f32 1.442695, %v987_v3  ;;  %v990_v12 = vsub.f32 %v2826_v11, %v954_v6 }
 0x251   :  { %v2859_v9 = vpop.eup %2262  ;;  %v942_v13 = vmax.f32 %v940_v45, %v941_v55  ;;  %v971_v14 = vrot.slane %v970_v62, 1  ;;  %v1045_v16 = vrot.slane %v2856_v5, 4  ;;  %v958_v24 = vmax.f32 %v956_v59, %v957_v8 }
 0x252   :  { %v1033_v17 = vrot.slane %v2859_v9, 4  ;;  %2274 = vpow2.f32 %v1011_v10  ;;  %v1017_v18 = vmul.f32 1.442695, %v990_v12  ;;  %v1029_v23 = vrot.slane %v1028_v7, 2 }
 0x253   :  { %v988_v20 = vsub.f32 %v2830_v19, %v942_v13  ;;  %v972_v21 = vmax.f32 %v970_v62, %v971_v14  ;;  %v1041_v31 = vrot.slane %v1040_v4, 2  ;;  %v1046_v19 = vadd.f32 %v2856_v5, %v1045_v16 }
 0x254   :  { %v2868_v22 = vpop.eup %2264  ;;  %v1034_v11 = vadd.f32 %v2859_v9, %v1033_v17  ;;  %2276 = vpow2.f32 %v1017_v18  ;;  %v959_v32 = vrot.slane %v958_v24, 1  ;;  %v973_v33 = vrot.slane %v2862_v15, 4 }
 0x255   :  { %v1063_v26 = vrot.slane %v2868_v22, 4  ;;  %v1013_v27 = vmul.f32 1.442695, %v988_v20  ;;  %v993_v0 = vsub.f32 %v2835_v28, %v972_v21  ;;  %v1030_v30 = vadd.f32 %v1029_v23, %v1028_v7 }
 0x256   :  { %v2875_v29 = vpop.eup %2266  ;;  %v1035_v34 = vrot.slane %v1034_v11, 2  ;;  %v960_v40 = vmax.f32 %v958_v24, %v959_v32  ;;  %v974_v28 = vmax.f32 %v2862_v15, %v973_v33  ;;  %v961_v41 = vrot.slane %v2873_v25, 4 }
 0x257   :  { %v1051_v35 = vrot.slane %v2875_v29, 4  ;;  %2278 = vpow2.f32 %v1013_v27  ;;  %v1023_v36 = vmul.f32 1.442695, %v993_v0  ;;  %v1064_v42 = vadd.f32 %v2868_v22, %v1063_v26 }
 0x258   :  { %v2880_v38 = vpop.eup %2268  ;;  %v1042_v49 = vadd.f32 %v1041_v31, %v1040_v4  ;;  %v991_v37 = vsub.f32 %v2841_v39, %v960_v40  ;;  %v975_v51 = vrot.slane %v974_v28, 2  ;;  %v962_v47 = vmax.f32 %v2873_v25, %v961_v41 }
 0x259   :  { %v1052_v43 = vadd.f32 %v2875_v29, %v1051_v35  ;;  %v1069_v44 = vrot.slane %v2880_v38, 4  ;;  %2280 = vpow2.f32 %v1023_v36  ;;  %v1047_v52 = vrot.slane %v1046_v19, 2 }
 0x25a   :  { %v2887_v48 = vpop.eup %2270  ;;  %v1036_v53 = vadd.f32 %v1035_v34, %v1034_v11  ;;  %v1019_v59 = vmul.f32 1.442695, %v991_v37  ;;  %v976_v60 = vmax.f32 %v974_v28, %v975_v51  ;;  %v963_v61 = vrot.slane %v962_v47, 2 }
 0x25b   :  { %v1070_v54 = vadd.f32 %v2880_v38, %v1069_v44  ;;  %v1057_v45 = vrot.slane %v2887_v48, 4  ;;  %v1053_v58 = vrot.slane %v1052_v43, 2  ;;  %v1065_v3 = vrot.slane %v1064_v42, 2 }
 0x25c   :  { %v1031_v39 = vrot.slane %v1030_v30, 1  ;;  %2282 = vpow2.f32 %v1019_v59  ;;  %v977_v7 = vrot.slane %v976_v60, 1  ;;  %v964_v8 = vmax.f32 %v962_v47, %v963_v61 }
 0x25d   :  { %v2893_v1 = vpop.eup %2272  ;;  %v1071_v6 = vrot.slane %v1070_v54, 2  ;;  %v1058_v55 = vadd.f32 %v2887_v48, %v1057_v45  ;;  %v1048_v10 = vadd.f32 %v1047_v52, %v1046_v19  ;;  %v1037_v13 = vrot.slane %v1036_v53, 1 }
 0x25e   :  { %v1087_v62 = vrot.slane %v2893_v1, 4  ;;  %v1054_v4 = vadd.f32 %v1053_v58, %v1052_v43  ;;  %v978_v16 = vmax.f32 %v976_v60, %v977_v7  ;;  %v965_v17 = vrot.slane %v964_v8, 1 }
 0x25f   :  { %v1059_v12 = vrot.slane %v1058_v55, 2  ;;  %v2897_v14 = vpop.eup %2274  ;;  %v1043_v18 = vrot.slane %v1042_v49, 1  ;;  %v1066_v20 = vadd.f32 %v1065_v3, %v1064_v42  ;;  %v1032_v11 = vadd.f32 %v1031_v39, %v1030_v30 }
 0x260   :  { %v1088_v21 = vadd.f32 %v2893_v1, %v1087_v62  ;;  %v1075_v23 = vrot.slane %v2897_v14, 4  ;;  %v1072_v26 = vadd.f32 %v1071_v6, %v1070_v54  ;;  %v994_v0 = vsub.f32 %v2862_v15, %v978_v16 }
 0x261   :  { %v2901_v24 = vpop.eup %2276  ;;  %v1060_v27 = vadd.f32 %v1059_v12, %v1058_v55  ;;  %v966_v31 = vmax.f32 %v964_v8, %v965_v17  ;;  %v1038_v33 = vadd.f32 %v1037_v13, %v1036_v53  ;;  %v1049_v34 = vrot.slane %v1048_v10, 1 }
 0x262   :  { %v1076_v19 = vadd.f32 %v2897_v14, %v1075_v23  ;;  %v1093_v32 = vrot.slane %v2901_v24, 4  ;;  %v1025_v36 = vmul.f32 1.442695, %v994_v0  ;;  %v1044_v28 = vadd.f32 %v1043_v18, %v1042_v49 }
 0x263   :  { %v992_v40 = vsub.f32 %v2873_v25, %v966_v31  ;;  %v1055_v30 = vrot.slane %v1054_v4, 1  ;;  %v1089_v41 = vrot.slane %v1088_v21, 2  ;;  %v1061_v51 = vrot.slane %v1060_v27, 1 }
 0x264   :  { %v2906_v35 = vpop.eup %2278  ;;  %v1077_v42 = vrot.slane %v1076_v19, 2  ;;  %v1094_v43 = vadd.f32 %v2901_v24, %v1093_v32  ;;  %2284 = vpow2.f32 %v1025_v36  ;;  %v1067_v47 = vrot.slane %v1066_v20, 1 }
 0x265   :  { %v1081_v15 = vrot.slane %v2906_v35, 4  ;;  %v1021_v37 = vmul.f32 1.442695, %v992_v40  ;;  %v1050_v49 = vadd.f32 %v1049_v34, %v1048_v10  ;;  %v1056_v45 = vadd.f32 %v1055_v30, %v1054_v4 }
 0x266   :  { %v2911_v44 = vpop.eup %2280  ;;  %v1078_v52 = vadd.f32 %v1077_v42, %v1076_v19  ;;  %v1095_v53 = vrot.slane %v1094_v43, 2  ;;  %v1073_v58 = vrot.slane %v1072_v26, 1  ;;  %v1090_v59 = vadd.f32 %v1089_v41, %v1088_v21 }
 0x267   :  { %v1082_v54 = vadd.f32 %v2906_v35, %v1081_v15  ;;  %v1111_v25 = vrot.slane %v2911_v44, 4  ;;  %2286 = vpow2.f32 %v1021_v37  ;;  %v1062_v6 = vadd.f32 %v1061_v51, %v1060_v27 }
 0x268   :  { %2288 = vrcp.f32 %v1032_v11  ;;  %v1096_v3 = vadd.f32 %v1095_v53, %v1094_v43  ;;  %v1068_v55 = vadd.f32 %v1067_v47, %v1066_v20  ;;  %v1079_v8 = vrot.slane %v1078_v52, 1 }
 0x269   :  { %v1083_v60 = vrot.slane %v1082_v54, 2  ;;  %v1112_v61 = vadd.f32 %v2911_v44, %v1111_v25  ;;  %2290 = vrcp.f32 %v1038_v33  ;;  %v2916_v39 = vpop.eup %2282  ;;  %v1074_v10 = vadd.f32 %v1073_v58, %v1072_v26 }
 0x26a   :  { %2292 = vrcp.f32 %v1044_v28  ;;  %v1099_v12 = vrot.slane %v2916_v39, 4  ;;  %v1091_v16 = vrot.slane %v1090_v59, 1  ;;  %v1097_v18 = vrot.slane %v1096_v3, 1 }
 0x26b   :  { %v1084_v62 = vadd.f32 %v1083_v60, %v1082_v54  ;;  %v1113_v7 = vrot.slane %v1112_v61, 2  ;;  %2294 = vrcp.f32 %v1050_v49  ;;  %v1080_v20 = vadd.f32 %v1079_v8, %v1078_v52 }
 0x26c   :  { %2296 = vrcp.f32 %v1056_v45  ;;  %v1100_v17 = vadd.f32 %v2916_v39, %v1099_v12  ;;  %v1092_v27 = vadd.f32 %v1091_v16, %v1090_v59  ;;  %v1098_v31 = vadd.f32 %v1097_v18, %v1096_v3 }
 0x26d   :  { %v1114_v13 = vadd.f32 %v1113_v7, %v1112_v61  ;;  %v1085_v4 = vrot.slane %v1084_v62, 1  ;;  %2298 = vrcp.f32 %v1062_v6 }
 0x26e   :  { %2300 = vrcp.f32 %v1068_v55  ;;  %v1101_v23 = vrot.slane %v1100_v17, 2 }
 0x26f   :  { %v1115_v21 = vrot.slane %v1114_v13, 1  ;;  %2302 = vrcp.f32 %v1074_v10  ;;  %v1086_v11 = vadd.f32 %v1085_v4, %v1084_v62 }
 0x270   :  { %v1102_v0 = vadd.f32 %v1101_v23, %v1100_v17  ;;  %2304 = vrcp.f32 %v1080_v20 }
 0x271   :  { %v2920_v19 = vpop.eup %2284  ;;  %v1116_v26 = vadd.f32 %v1115_v21, %v1114_v13  ;;  %2306 = vrcp.f32 %v1086_v11 }
 0x272   :  { %v1117_v32 = vrot.slane %v2920_v19, 4  ;;  %v1103_v33 = vrot.slane %v1102_v0, 1  ;;  %2308 = vrcp.f32 %v1092_v27 }
 0x273   :  { %2310 = vrcp.f32 %v1098_v31 }
 0x274   :  { %v2923_v34 = vpop.eup %2286  ;;  %v1118_v40 = vadd.f32 %v2920_v19, %v1117_v32  ;;  %v1104_v30 = vadd.f32 %v1103_v33, %v1102_v0  ;;  %2312 = vrcp.f32 %v1116_v26 }
 0x275   :  { %v2289_v36 = vpop.eup %2288  ;;  %v1105_v28 = vrot.slane %v2923_v34, 4 }
 0x276   :  { %v2291_v41 = vpop.eup %2290  ;;  %v1139_v42 = vmul.f32 %v2289_v36, %v2850_v57  ;;  %v1119_v15 = vrot.slane %v1118_v40, 2  ;;  %2314 = vrcp.f32 %v1104_v30 }
 0x277   :  { %v2293_v43 = vpop.eup %2292  ;;  %v1106_v37 = vadd.f32 %v2923_v34, %v1105_v28  ;;  %v1140_v51 = vmul.f32 %v2291_v41, %v2859_v9 }
 0x278   :  { %v2295_v47 = vpop.eup %2294  ;;  %v1141_v52 = vmul.f32 %v2293_v43, %v2845_v50  ;;  %v1155_v53 = vmul.f32 %v1139_v42, %v2798_v63  ;;  %v1120_v9 = vadd.f32 %v1119_v15, %v1118_v40 }
 0x279   :  { %v2297_v54 = vpop.eup %2296  ;;  %v1107_v25 = vrot.slane %v1106_v37, 2  ;;  %v1142_v49 = vmul.f32 %v2295_v47, %v2856_v5  ;;  %v1156_v45 = vmul.f32 %v1140_v51, %v2798_v63 }
 0x27a   :  { %v2299_v57 = vpop.eup %2298  ;;  %v1143_v58 = vmul.f32 %v2297_v54, %v2875_v29  ;;  %v1157_v59 = vmul.f32 %v1141_v52, %v2798_v63  ;;  %v1171_v60 = vrot.slane %v1155_v53, 4  ;;  %v1121_v28 = vrot.slane %v1120_v9, 1 }
 0x27b   :  { %v2301_v61 = vpop.eup %2300  ;;  %v1144_v3 = vmul.f32 %v2299_v57, %v2887_v48  ;;  %v1158_v50 = vmul.f32 %v1142_v49, %v2798_v63  ;;  %v1177_v6 = vrot.slane %v1156_v45, 4  ;;  %v1108_v12 = vadd.f32 %v1107_v25, %v1106_v37 }
 0x27c   :  { %v2303_v55 = vpop.eup %2302  ;;  %v1145_v62 = vmul.f32 %v2301_v61, %v2868_v22  ;;  %v1159_v5 = vmul.f32 %v1143_v58, %v2798_v63  ;;  %v1172_v7 = vadd.f32 %v1171_v60, %v1155_v53  ;;  %v1183_v8 = vrot.slane %v1157_v59, 4 }
 0x27d   :  { %v1160_v29 = vmul.f32 %v1144_v3, %v2798_v63  ;;  %v1178_v10 = vadd.f32 %v1177_v6, %v1156_v45  ;;  %v1189_v13 = vrot.slane %v1158_v50, 4  ;;  %v1146_v4 = vmul.f32 %v2303_v55, %v2880_v38  ;;  %v2305_v18 = vpop.eup %2304 }
 0x27e   :  { %v1173_v16 = vrot.slane %v1172_v7, 2  ;;  %v1184_v17 = vadd.f32 %v1183_v8, %v1157_v59  ;;  %v1195_v48 = vrot.slane %v1159_v5, 4  ;;  %v1161_v20 = vmul.f32 %v1145_v62, %v2798_v63  ;;  %v2307_v23 = vpop.eup %2306 }
 0x27f   :  { %v1179_v21 = vrot.slane %v1178_v10, 2  ;;  %v1190_v11 = vadd.f32 %v1189_v13, %v1158_v50  ;;  %v1201_v27 = vrot.slane %v1160_v29, 4  ;;  %v2309_v0 = vpop.eup %2308  ;;  %v1109_v32 = vrot.slane %v1108_v12, 1 }
 0x280   :  { %v1174_v22 = vadd.f32 %v1173_v16, %v1172_v7  ;;  %v1185_v26 = vrot.slane %v1184_v17, 2  ;;  %v2311_v33 = vpop.eup %2310  ;;  %v2944_v36 = vmul.f32 %v1146_v4, %v2798_v63  ;;  %v1196_v40 = vadd.f32 %v1195_v48, %v1159_v5 }
 0x281   :  { %v1180_v31 = vadd.f32 %v1179_v21, %v1178_v10  ;;  %v2313_v30 = vpop.eup %2312  ;;  %v1207_v42 = vrot.slane %v1161_v20, 4  ;;  %v1110_v43 = vadd.f32 %v1109_v32, %v1108_v12  ;;  %v1147_v15 = vmul.f32 %v2305_v18, %v2897_v14 }
 0x282   :  { %v1175_v38 = vrot.slane %v1174_v22, 1  ;;  %v1191_v51 = vrot.slane %v1190_v11, 2  ;;  %v1202_v47 = vadd.f32 %v1201_v27, %v1160_v29  ;;  %v1122_v52 = vadd.f32 %v1121_v28, %v1120_v9 }
 0x283   :  { %v1181_v41 = vrot.slane %v1180_v31, 1  ;;  %v2315_v37 = vpop.eup %2314  ;;  %v1148_v53 = vmul.f32 %v2307_v23, %v2906_v35  ;;  %v1186_v54 = vadd.f32 %v1185_v26, %v1184_v17  ;;  %2316 = vrcp.f32 %v1110_v43 }
 0x284   :  { %v1149_v63 = vmul.f32 %v2309_v0, %v2893_v1  ;;  %v1150_v25 = vmul.f32 %v2311_v33, %v2901_v24  ;;  %v2950_v49 = vadd.f32 %v1175_v38, %v1174_v22  ;;  %2318 = vrcp.f32 %v1122_v52 }
 0x285   :  { %v2952_v45 = vadd.f32 %v1181_v41, %v1180_v31  ;;  %v1151_v57 = vmul.f32 %v2315_v37, %v2916_v39  ;;  %v1153_v14 = vmul.f32 %v2313_v30, %v2911_v44  ;;  %v1163_v58 = vmul.f32 %v1147_v15, %v2800_v2 }
 0x286   :  { %v1164_v59 = vmul.f32 %v1148_v53, %v2800_v2  ;;  %v1165_v35 = vmul.f32 %v1149_v63, %v2800_v2  ;;  %v1192_v60 = vadd.f32 %v1191_v51, %v1190_v11  ;;  %v1197_v61 = vrot.slane %v1196_v40, 2 }
 0x287   :  { %v1166_v1 = vmul.f32 %v1150_v25, %v2800_v2  ;;  %v1167_v24 = vmul.f32 %v1151_v57, %v2800_v2  ;;  %v1187_v9 = vrot.slane %v1186_v54, 1  ;;  %v1219_v3 = vrot.slane %v1163_v58, 4 }
 0x288   :  { %v1225_v50 = vrot.slane %v1164_v59, 4  ;;  %v1231_v6 = vrot.slane %v1165_v35, 4  ;;  %v1267_v39 = vpack.c.bf16 %v2950_v49, %v2950_v49  ;;  %v1268_v44 = vpack.c.bf16 %v2952_v45, %v2952_v45 }
 0x289   :  { %v1237_v55 = vrot.slane %v1166_v1, 4  ;;  %v1243_v62 = vrot.slane %v1167_v24, 4  ;;  %v1169_v5 = vmul.f32 %v1153_v14, %v2800_v2  ;;  %v1220_v7 = vadd.f32 %v1219_v3, %v1163_v58 }
 0x28a   :  { %v1226_v8 = vadd.f32 %v1225_v50, %v1164_v59  ;;  %v1232_v12 = vadd.f32 %v1231_v6, %v1165_v35  ;;  %v1198_v13 = vadd.f32 %v1197_v61, %v1196_v40  ;;  %v1203_v4 = vrot.slane %v1202_v47, 2 }
 0x28b   :  { %v1238_v29 = vadd.f32 %v1237_v55, %v1166_v1  ;;  %v1244_v10 = vadd.f32 %v1243_v62, %v1167_v24  ;;  %v1221_v16 = vrot.slane %v1220_v7, 2  ;;  %v1208_v18 = vadd.f32 %v1207_v42, %v1161_v20 }
 0x28c   :  { %v1227_v17 = vrot.slane %v1226_v8, 2  ;;  %v1233_v48 = vrot.slane %v1232_v12, 2  ;;  %v1193_v22 = vrot.slane %v1192_v60, 1  ;;  %v1204_v11 = vadd.f32 %v1203_v4, %v1202_v47 }
 0x28d   :  { %v1239_v21 = vrot.slane %v1238_v29, 2  ;;  %v1245_v23 = vrot.slane %v1244_v10, 2  ;;  %v1222_v27 = vadd.f32 %v1221_v16, %v1220_v7  ;;  %v1209_v26 = vrot.slane %v1208_v18, 2 }
 0x28e   :  { %v1228_v0 = vadd.f32 %v1227_v17, %v1226_v8  ;;  %v1234_v31 = vadd.f32 %v1233_v48, %v1232_v12  ;;  %v1199_v33 = vrot.slane %v1198_v13, 1  ;;  %v1205_v38 = vrot.slane %v1204_v11, 1 }
 0x28f   :  { %v1240_v32 = vadd.f32 %v1239_v21, %v1238_v29  ;;  %v1213_v28 = vrot.slane %v2944_v36, 4  ;;  %v1223_v30 = vrot.slane %v1222_v27, 1  ;;  %v1210_v41 = vadd.f32 %v1209_v26, %v1208_v18 }
 0x290   :  { %v1229_v40 = vrot.slane %v1228_v0, 1  ;;  %v1246_v43 = vadd.f32 %v1245_v23, %v1244_v10  ;;  %v2317_v15 = vpop.eup %2316  ;;  %v1235_v37 = vrot.slane %v1234_v31, 1  ;;  %v1255_v20 = vrot.slane %v1169_v5, 4 }
 0x291   :  { %v1188_v42 = vadd.f32 %v1187_v9, %v1186_v54  ;;  %v1214_v51 = vadd.f32 %v1213_v28, %v2944_v36  ;;  %v2319_v47 = vpop.eup %2318  ;;  %v1152_v52 = vmul.f32 %v2317_v15, %v2923_v34  ;;  %v1224_v53 = vadd.f32 %v1223_v30, %v1222_v27 }
 0x292   :  { %v1211_v63 = vrot.slane %v1210_v41, 1  ;;  %v1241_v25 = vrot.slane %v1240_v32, 1  ;;  %v1154_v57 = vmul.f32 %v2319_v47, %v2920_v19  ;;  %v1230_v14 = vadd.f32 %v1229_v40, %v1228_v0 }
 0x293   :  { %v1194_v58 = vadd.f32 %v1193_v22, %v1192_v60  ;;  %v1215_v59 = vrot.slane %v1214_v51, 2  ;;  %v1168_v35 = vmul.f32 %v1152_v52, %v2800_v2  ;;  %v1200_v61 = vadd.f32 %v1199_v33, %v1198_v13 }
 0x294   :  { %v1206_v1 = vadd.f32 %v1205_v38, %v1204_v11  ;;  %v1247_v24 = vrot.slane %v1246_v43, 1  ;;  %v1170_v54 = vmul.f32 %v1154_v57, %v2800_v2  ;;  %v1236_v9 = vadd.f32 %v1235_v37, %v1234_v31 }
 0x295   :  { %v1216_v36 = vadd.f32 %v1215_v59, %v1214_v51  ;;  %v1256_v3 = vadd.f32 %v1255_v20, %v1169_v5  ;;  %v1249_v34 = vrot.slane %v1168_v35, 4  ;;  %v1275_v50 = vpack.c.bf16 %v1224_v53, %v1224_v53 }
 0x296   :  { %v1212_v6 = vadd.f32 %v1211_v63, %v1210_v41  ;;  %v1242_v55 = vadd.f32 %v1241_v25, %v1240_v32  ;;  %v1276_v19 = vpack.c.bf16 %v1230_v14, %v1230_v14  ;;  %v1261_v7 = vrot.slane %v1170_v54, 4 }
 0x297   :  { %v1217_v60 = vrot.slane %v1216_v36, 1  ;;  %v1257_v62 = vrot.slane %v1256_v3, 2  ;;  %v1250_v8 = vadd.f32 %v1249_v34, %v1168_v35  ;;  %v1248_v12 = vadd.f32 %v1247_v24, %v1246_v43 }
 0x298   :  { %v1269_v29 = vpack.c.bf16 %v1188_v42, %v1188_v42  ;;  %v1270_v10 = vpack.c.bf16 %v1194_v58, %v1194_v58  ;;  %v1262_v13 = vadd.f32 %v1261_v7, %v1170_v54  ;;  %v1271_v4 = vpack.c.bf16 %v1200_v61, %v1200_v61 }
 0x299   :  { %v1258_v2 = vadd.f32 %v1257_v62, %v1256_v3  ;;  %v1272_v5 = vpack.c.bf16 %v1206_v1, %v1206_v1  ;;  %v1251_v16 = vrot.slane %v1250_v8, 2  ;;  %v1273_v17 = vpack.c.bf16 %v1212_v6, %v1212_v6 }
 0x29a   :  { %v1277_v48 = vpack.c.bf16 %v1236_v9, %v1236_v9  ;;  %v1278_v18 = vpack.c.bf16 %v1242_v55, %v1242_v55  ;;  %v1218_v21 = vadd.f32 %v1217_v60, %v1216_v36  ;;  %v1263_v22 = vrot.slane %v1262_v13, 2 }
 0x29b   :  { %v1259_v23 = vrot.slane %v1258_v2, 1  ;;  %v1323_v11 = vunpack.c.l.b16 %v1268_v44  ;;  %v1252_v27 = vadd.f32 %v1251_v16, %v1250_v8  ;;  %v1279_v0 = vpack.c.bf16 %v1248_v12, %v1248_v12  ;;  %v2328_v8 = vld [vmem:[#allocation7] sm:$0xff] }
 0x29c   :  { %v1322_v31 = vunpack.c.l.b16 %v1267_v39  ;;  %v1324_v26 = vunpack.c.l.b16 %v1269_v29  ;;  %v1264_v33 = vadd.f32 %v1263_v22, %v1262_v13  ;;  %v1325_v38 = vunpack.c.l.b16 %v1270_v10  ;;  %v2329_v13 = vld [vmem:[#allocation7 + $0x8] sm:$0xff] }
 0x29d   :  { %v1260_v32 = vadd.f32 %v1259_v23, %v1258_v2  ;;  %v1326_v28 = vunpack.c.l.b16 %v1271_v4  ;;  %v1253_v30 = vrot.slane %v1252_v27, 1  ;;  %v1327_v40 = vunpack.c.l.b16 %v1272_v5  ;;  %v2216_v5 = vld [vmem:[#allocation16 + $0x70] ss:$8 sps:$4 sm:$0xff]   ;;  %v2218_v16 = vld [vmem:[#allocation16 + $0x74] ss:$8 sps:$4 sm:$0xff]  }
 0x29e   :  { %v1330_v41 = vunpack.c.l.b16 %v1275_v50  ;;  %v1331_v43 = vunpack.c.l.b16 %v1276_v19  ;;  %v1265_v15 = vrot.slane %v1264_v33, 1  ;;  %v1332_v37 = vunpack.c.l.b16 %v1277_v48  ;;  %v1925_v19 = vld [vmem:[%s3039_s10] ss:$0 sm:$0xff]  ;;  %1602 = vmatprep.subr.bf16.mxu1 %v2218_v16 }
 0x29f   :  { %v1333_v20 = vunpack.c.l.b16 %v1278_v18  ;;  %v1339_v45 = vsel %vm1338_vm1, %v1323_v11, %v1322_v31  ;;  %v1254_v44 = vadd.f32 %v1253_v30, %v1252_v27  ;;  %v1281_v42 = vpack.c.bf16 %v1260_v32, %v1260_v32  ;;  %1603 = vmatpush1.bf16.msra.mxu1 %v2216_v5  ;;  %v2221_v31 = vld [vmem:[#allocation16 + $0x64] ss:$8 sps:$4 sm:$0xff]   ;;  %v2224_v32 = vld [vmem:[#allocation16 + $0x54] ss:$8 sps:$4 sm:$0xff]  }
 0x2a0   :  { %v1341_v51 = vsel %vm1340_vm2, %v1324_v26, %v1339_v45  ;;  %v1352_v49 = vsel %vm1338_vm1, %v1331_v43, %v1330_v41  ;;  %v1266_v39 = vadd.f32 %v1265_v15, %v1264_v33  ;;  %v1334_v47 = vunpack.c.l.b16 %v1279_v0  ;;  %v2219_v0 = vld [vmem:[#allocation16 + $0x60] ss:$8 sps:$4 sm:$0xff]   ;;  %1604 = vmatprep.subr.bf16.mxu1 %v2221_v31  ;;  %v2222_v26 = vld [vmem:[#allocation16 + $0x50] ss:$8 sps:$4 sm:$0xff]   ;;  %v2227_v33 = vld [vmem:[#allocation16 + $0x44] ss:$8 sps:$4 sm:$0xff]  }
 0x2a1   :  { %v1343_v52 = vsel %vm1342_vm3, %v1325_v38, %v1341_v51  ;;  %v1353_v53 = vsel %vm1340_vm2, %v1332_v37, %v1352_v49  ;;  %v1274_v63 = vpack.c.bf16 %v1218_v21, %v1218_v21  ;;  %v1280_v25 = vpack.c.bf16 %v1254_v44, %v1254_v44  ;;  %v2225_v38 = vld [vmem:[#allocation16 + $0x40] ss:$8 sps:$4 sm:$0xff]   ;;  %v2233_v41 = vld [vmem:[#allocation16 + $0x24] ss:$8 sps:$4 sm:$0xff]   ;;  %v2240_v43 = vld [vmem:[#allocation17 + $0x78] sm:$0xff]  }
 0x2a2   :  { %v1345_v57 = vsel %vm1344_vm4, %v1326_v28, %v1343_v52  ;;  %v1354_v14 = vsel %vm1342_vm3, %v1333_v20, %v1353_v53  ;;  %v1282_v58 = vpack.c.bf16 %v1266_v39, %v1266_v39  ;;  %v1328_v59 = vunpack.c.l.b16 %v1273_v17  ;;  %v2230_v28 = vld [vmem:[#allocation16 + $0x34] ss:$8 sps:$4 sm:$0xff]   ;;  %2023 = vmatprep.subr.bf16.mxu0 %v2240_v43  ;;  %v2231_v20 = vld [vmem:[#allocation16 + $0x20] ss:$8 sps:$4 sm:$0xff]   ;;  %v2234_v51 = vld [vmem:[#allocation16 + $0x10] ss:$8 sps:$4 sm:$0xff]  }
 0x2a3   :  { %v1347_v35 = vsel %vm1346_vm5, %v1327_v40, %v1345_v57  ;;  %v1335_v61 = vunpack.c.l.b16 %v1280_v25  ;;  %v1336_v1 = vunpack.c.l.b16 %v1281_v42  ;;  %v1355_v54 = vsel %vm1344_vm4, %v1334_v47, %v1354_v14  ;;  %1605 = vmatpush1.bf16.msra.mxu1 %v2219_v0  ;;  %v2228_v40 = vld [vmem:[#allocation16 + $0x30] ss:$8 sps:$4 sm:$0xff]   ;;  %v2236_v44 = vld [vmem:[#allocation16 + $0x14] ss:$8 sps:$4 sm:$0xff]   ;;  %v2244_v42 = vld [vmem:[#allocation17 + $0x68] sm:$0xff]  }
 0x2a4   :  { %v1349_v24 = vsel %vm1348_vm6, %v1328_v59, %v1347_v35  ;;  %v1329_v36 = vunpack.c.l.b16 %v1274_v63  ;;  %v1337_v9 = vunpack.c.l.b16 %v1282_v58  ;;  %1606 = vmatprep.subr.bf16.mxu1 %v2224_v32  ;;  %v2581_v30 = vmov 0   ;;  %v2241_v15 = vld [vmem:[#allocation17 + $0x38] sm:$0xff]   ;;  %v2242_v37 = vld [vmem:[#allocation17 + $0x70] sm:$0xff]   ;;  %v2245_v49 = vld [vmem:[#allocation17 + $0x28] sm:$0xff]  }
 0x2a5   :  { %v1356_v3 = vsel %vm1346_vm5, %v1335_v61, %v1355_v54  ;;  %1634 = vmatprep.mubr.bf16.mxu1 %v2581_v30  ;;  %v2243_v45 = vld [vmem:[#allocation17 + $0x30] sm:$0xff]   ;;  %v2239_v39 = vld [vmem:[#allocation16 + $0x4] ss:$8 sps:$4 sm:$0xff]   ;;  %v2237_v52 = vld [vmem:[#allocation16] ss:$8 sps:$4 sm:$0xff]  }
 0x2a6   :  { %v1357_v34 = vsel %vm1348_vm6, %v1336_v1, %v1356_v3  ;;  %v1351_v50 = vsel %vm1350_vm7, %v1329_v36, %v1349_v24  ;;  %v2246_v47 = vld [vmem:[#allocation17 + $0x60] sm:$0xff]   ;;  %v2248_v63 = vld [vmem:[#allocation17 + $0x58] sm:$0xff]   ;;  %v1934_v54 = vld [vmem:[%s3040_s11] ss:$0 sm:$0xff] }
 0x2a7   :  { %v1358_v6 = vsel %vm1350_vm7, %v1337_v9, %v1357_v34  ;;  %1607 = vmatpush1.bf16.msra.mxu1 %v2222_v26  ;;  %v2247_v53 = vld [vmem:[#allocation17 + $0x20] sm:$0xff]   ;;  %v2249_v25 = vld [vmem:[#allocation17 + $0x18] sm:$0xff]   ;;  %v1935_v34 = vld [vmem:[%s3041_s12] ss:$0 sm:$0xff] }
 0x2a8   :  { %v1359_v55 = vpack.c.b16 %v1358_v6, %v1351_v50  ;;  %1608 = vmatprep.subr.bf16.mxu1 %v2227_v33 }
 0x2aa   :  { %2154 = vmatmul.mubr.bf16.vlgmr.msra.gmra.mxu0 %v1359_v55 }
 0x2ab   :  { %1609 = vmatpush1.bf16.msra.mxu1 %v2225_v38  ;;  %2024 = vmatpush3.bf16.msra.mxu0 %v2241_v15 }
 0x2ac   :  { %1610 = vmatprep.subr.bf16.mxu1 %v2230_v28  ;;  %2025 = vmatprep.subr.bf16.mxu0 %v2242_v37 }
 0x2af   :  { %1611 = vmatpush1.bf16.msra.mxu1 %v2228_v40  ;;  %2026 = vmatpush3.bf16.msra.mxu0 %v2243_v45 }
 0x2b0   :  { %1612 = vmatprep.subr.bf16.mxu1 %v2233_v41  ;;  %2027 = vmatprep.subr.bf16.mxu0 %v2244_v42 }
 0x2b3   :  { %1613 = vmatpush1.bf16.msra.mxu1 %v2231_v20  ;;  %2028 = vmatpush3.bf16.msra.mxu0 %v2245_v49 }
 0x2b4   :  { %1614 = vmatprep.subr.bf16.mxu1 %v2236_v44  ;;  %2029 = vmatprep.subr.bf16.mxu0 %v2246_v47 }
 0x2b7   :  { %1615 = vmatpush1.bf16.msra.mxu1 %v2234_v51  ;;  %2030 = vmatpush3.bf16.msra.mxu0 %v2247_v53 }
 0x2b8   :  { %1616 = vmatprep.subr.bf16.mxu1 %v2239_v39  ;;  %2031 = vmatprep.subr.bf16.mxu0 %v2248_v63 }
 0x2bb   :  { %1617 = vmatpush1.bf16.msra.mxu1 %v2237_v52  ;;  %2032 = vmatpush3.bf16.msra.mxu0 %v2249_v25 }
 0x36a   :  { %v1443_v60 = vpop.f32.mrf.mxu0 }
 0x36b   :  { %v1444_v62 = vadd.f32 %v1925_v19, %v1443_v60  ;;  %v2250_v60 = vld [vmem:[#allocation17 + $0x50] sm:$0xff]  }
 0x36c   :  { %v2155_v7 = vpop.f32.mrf.mxu0  ;;  %2033 = vmatprep.subr.bf16.mxu0 %v2250_v60 }
 0x36d   :  { %v1450_v12 = vadd.f32 %v2328_v8, %v1444_v62  ;;  %v2251_v62 = vld [vmem:[#allocation17 + $0x10] sm:$0xff]   ;;  %v2252_v7 = vld [vmem:[#allocation17 + $0x48] sm:$0xff]  }
 0x36e   :  { %v1446_v29 = vpop.f32.mrf.mxu0  ;;  %2034 = vmatpush3.bf16.msra.mxu0 %v2251_v62  ;;  %v2253_v8 = vld [vmem:[#allocation17 + $0x8] sm:$0xff]  }
 0x36f   :  { %v1447_v10 = vadd.f32 %v1925_v19, %v1446_v29  ;;  %1454 = vadd.xlane.f32.xlu0 %v1450_v12  ;;  %2035 = vmatprep.subr.bf16.mxu0 %v2252_v7  ;;  %v2255_v29 = vld [vmem:[#allocation17] sm:$0xff]  }
 0x370   :  { %v2156_v2 = vpop.f32.mrf.mxu0 }
 0x371   :  { %v1451_v4 = vadd.f32 %v2329_v13, %v1447_v10  ;;  %v1518_v10 = vsub.s32 1, %v2766_v46  ;;  %v1510_v2 = vld [vmem:[%s3042_s13] sm:$0x3] }
 0x372   :  { %2036 = vmatpush3.bf16.msra.mxu0 %v2253_v8  ;;  %v1515_v5 = vrot.slane %v1510_v2, %v2770_v56  ;;  %v1952_v56 = vld [vmem:[%s3043_s14] ss:$0 sm:$0xff] }
 0x373   :  { %1456 = vadd.xlane.f32.xlu0 %v1451_v4 }
 0x3f8   :  { %v1455_v17 = vpop.xlane.xlu0 %1454 }
 0x3f9   :  { %v1459_v48 = vmul.f32 0.0078125, %v1455_v17 }
 0x3fb   :  { %v2993_v18 = vsub.f32 %v1450_v12, %v1459_v48  ;;  %v2254_v12 = vld [vmem:[#allocation17 + $0x40] sm:$0xff]  }
 0x3fc   :  { %v1457_v21 = vpop.xlane.xlu0 %1456  ;;  %2037 = vmatprep.subr.bf16.mxu0 %v2254_v12 }
 0x3fd   :  { %v1460_v23 = vmul.f32 0.0078125, %v1457_v21  ;;  %v1463_v22 = vmul.f32 %v2993_v18, %v2993_v18  ;;  %2038 = vmatpush3.bf16.msra.mxu0 %v2255_v29 }
 0x3ff   :  { %v2997_v11 = vsub.f32 %v1451_v4, %v1460_v23  ;;  %1465 = vadd.xlane.f32.xlu1 %v1463_v22  ;;  %v1519_v4 = vrot.slane %v1510_v2, %v1518_v10 }
 0x401   :  { %v1464_v27 = vmul.f32 %v2997_v11, %v2997_v11 }
 0x403   :  { %1467 = vadd.xlane.f32.xlu1 %v1464_v27 }
 0x488   :  { %v1466_v57 = vpop.xlane.xlu1 %1465 }
 0x489   :  { %v1469_v14 = vmul.f32 0.0078125, %v1466_v57 }
 0x48b   :  { %v1471_v58 = vadd.f32 1e-05, %v1469_v14 }
 0x48c   :  { %v1468_v59 = vpop.xlane.xlu1 %1467 }
 0x48d   :  { %2320 = vrsqrt.f32 %v1471_v58  ;;  %v1470_v35 = vmul.f32 0.0078125, %v1468_v59  ;;  %v1969_v59 = vld [vmem:[%s3044_s15] ss:$0 sm:$0xff] }
 0x48f   :  { %v1472_v61 = vadd.f32 1e-05, %v1470_v35 }
 0x491   :  { %2322 = vrsqrt.f32 %v1472_v61  ;;  %v1970_v61 = vld [vmem:[%s3045_s16] ss:$0 sm:$0xff] }
 0x49a   :  { %v2321_v1 = vpop.eup %2320 }
 0x49b   :  { %v1475_v24 = vmul.f32 %v2321_v1, %v2993_v18 }
 0x49d   :  { %v1483_v3 = vmul.f32 %v1934_v54, %v1475_v24 }
 0x49e   :  { %v2323_v36 = vpop.eup %2322 }
 0x49f   :  { %v1476_v9 = vmul.f32 %v2323_v36, %v2997_v11  ;;  %v1491_v6 = vadd.f32 %v1935_v34, %v1483_v3 }
 0x4a1   :  { %v1484_v50 = vmul.f32 %v1934_v54, %v1476_v9 }
 0x4a3   :  { %v1492_v55 = vadd.f32 %v1935_v34, %v1484_v50 }
 0x4a5   :  { %v1493_v19 = vpack.c.bf16 %v1492_v55, %v1491_v6 }
 0x4a7   :  { %1635 = vmatmul.mubr.bf16.vlgmr.msra.gmra.mxu1 %v1493_v19 }
 0x567   :  { %v1636_v13 = vpop.f32.mrf.mxu1 }
 0x568   :  { %v1637_v21 = vadd.f32 %v1636_v13, %v1515_v5 }
 0x569   :  { %v1638_v16 = vpop.f32.mrf.mxu1 }
 0x56a   :  { %v1639_v48 = vadd.f32 %v1638_v16, %v1519_v4  ;;  %v1645_v31 = vmax.f32 %v1637_v21, 0.0 }
 0x56b   :  { %v1640_v17 = vpop.f32.mrf.mxu1 }
 0x56c   :  { %v1641_v18 = vadd.f32 %v1640_v17, %v1515_v5  ;;  %v1646_v27 = vmax.f32 %v1639_v48, 0.0 }
 0x56d   :  { %v1642_v23 = vpop.f32.mrf.mxu1 }
 0x56e   :  { %v1643_v22 = vadd.f32 %v1642_v23, %v1519_v4  ;;  %v1647_v11 = vmax.f32 %v1641_v18, 0.0 }
 0x570   :  { %v1648_v0 = vmax.f32 %v1643_v22, 0.0  ;;  %v1649_v26 = vpack.c.bf16 %v1647_v11, %v1645_v31 }
 0x572   :  { %v1650_v46 = vpack.c.bf16 %v1648_v0, %v1646_v27 }
 0x574   :  { %1818 = vmatprep.mubr.bf16.mxu0 %v1650_v46 }
 0x575   :  { %1819 = vmatmul.mubr.bf16.vlgmr.msra.gmra.mxu0 %v1649_v26 }
 0x635   :  { %v2039_v32 = vpop.f32.mrf.mxu0 }
 0x637   :  { %v2040_v33 = vpop.f32.mrf.mxu0 }
 0x638   :  { %v2041_v38 = vadd.f32 %v2040_v33, %v2039_v32 }
 0x639   :  { %v2042_v28 = vpop.f32.mrf.mxu0 }
 0x63a   :  { %v1821_v30 = vadd.f32 %v2041_v38, %v1952_v56 }
 0x63b   :  { %v2043_v40 = vpop.f32.mrf.mxu0 }
 0x63c   :  { %v2044_v41 = vadd.f32 %v2043_v40, %v2042_v28  ;;  %v1827_v43 = vadd.f32 %v1821_v30, %v1491_v6 }
 0x63e   :  { %v1824_v15 = vadd.f32 %v2044_v41, %v1952_v56  ;;  %1831 = vadd.xlane.f32.xlu0 %v1827_v43 }
 0x640   :  { %v1828_v37 = vadd.f32 %v1824_v15, %v1492_v55 }
 0x642   :  { %1833 = vadd.xlane.f32.xlu1 %v1828_v37 }
 0x6c7   :  { %v1832_v20 = vpop.xlane.xlu0 %1831 }
 0x6c8   :  { %v1835_v45 = vmul.f32 0.0078125, %v1832_v20 }
 0x6ca   :  { %v1837_v44 = vsub.f32 %v1827_v43, %v1835_v45 }
 0x6cb   :  { %v1834_v42 = vpop.xlane.xlu1 %1833 }
 0x6cc   :  { %v1836_v51 = vmul.f32 0.0078125, %v1834_v42  ;;  %v1839_v49 = vmul.f32 %v1837_v44, %v1837_v44 }
 0x6ce   :  { %v1838_v39 = vsub.f32 %v1828_v37, %v1836_v51  ;;  %1841 = vadd.xlane.f32.xlu0 %v1839_v49 }
 0x6d0   :  { %v1840_v47 = vmul.f32 %v1838_v39, %v1838_v39 }
 0x6d2   :  { %1843 = vadd.xlane.f32.xlu1 %v1840_v47 }
 0x757   :  { %v1842_v52 = vpop.xlane.xlu0 %1841 }
 0x758   :  { %v1845_v53 = vmul.f32 0.0078125, %v1842_v52 }
 0x75a   :  { %v1847_v63 = vadd.f32 1e-05, %v1845_v53 }
 0x75b   :  { %v1844_v25 = vpop.xlane.xlu1 %1843 }
 0x75c   :  { %2324 = vrsqrt.f32 %v1847_v63  ;;  %v1846_v57 = vmul.f32 0.0078125, %v1844_v25 }
 0x75e   :  { %v1848_v14 = vadd.f32 1e-05, %v1846_v57 }
 0x760   :  { %2326 = vrsqrt.f32 %v1848_v14 }
 0x769   :  { %v2325_v58 = vpop.eup %2324 }
 0x76a   :  { %v1851_v35 = vmul.f32 %v2325_v58, %v1837_v44 }
 0x76c   :  { %v1859_v1 = vmul.f32 %v1969_v59, %v1851_v35 }
 0x76d   :  { %v2327_v24 = vpop.eup %2326 }
 0x76e   :  { %v1852_v54 = vmul.f32 %v2327_v24, %v1838_v39  ;;  %v1867_v36 = vadd.f32 %v1970_v61, %v1859_v1 }
 0x770   :  { %v1860_v9 = vmul.f32 %v1969_v59, %v1852_v54  ;;  %1869 = vst [vmem:[#allocation19] sm:$0xff] %v1867_v36 }
 0x772   :  { %v1868_v3 = vadd.f32 %v1970_v61, %v1860_v9 }
 0x774   :  { %1870 = vst [vmem:[#allocation19 + $0x8] sm:$0xff] %v1868_v3 }
 0x775   :  { %2541 = shalt.err (!%p2538_p12)
}
 0x776   :  { %1882 = dma.vmem_to_hbm [thread:$0]  %s1877_s26, 256, %s3046_s17, [#allocation4], %s2566_s29, %s2566_s29, %s2567_s0  }
 0x777   :  { %2562 = dma.done.wait [#allocation4], 256  }
 0x778   :  { %2563 = vsyncadd [#allocation4], 4294967040 }
 0x779   :  { %1886 = vsyncpa [#allocation3], 1 }
 0x77a   :  { %1887 = vsyncpa [#allocation6], 1 }
 0x77b   :  { %1888 = vsyncpa [#allocation9], 1 }
 0x77c   :  { %1889 = vsyncpa [#allocation12], 1 }
 0x77d   :  { %1890 = vsyncpa [#allocation15], 1 }
 0x77e   :  { %1891 = vsyncpa [#allocation18], 1 }
 0x77f   :  { %1892 = vsyncpa [#allocation4], 1 }

</bundles_post_ra>
